<compile_context>
chip_gen: v7x
topology: tpu7x:2x2x1
jax: 0.10.0
libtpu: 0.0.40
codegen_flags: <defaults>
</compile_context>

<pallas_src>
import functools

import jax
import jax.numpy as jnp
from jax.experimental import pallas as pl
from jax.experimental.pallas import tpu as pltpu

_BN_EPS = 1e-5
_VMEM_LIMIT = 32 * 1024 * 1024


# ---------------------------------------------------------------------------
# Input prep: zero-pad (+ phase-decompose for stride 2) and flatten the
# spatial dims so that every 3x3 tap becomes a *contiguous* slice of the
# flattened input (replaces the old 9x im2col HBM blow-up).
# ---------------------------------------------------------------------------
def _prep_conv3_input(x_nhwc, stride):
    """Returns (xf, taps, pitch, (sc_phase, sc_off), Ho, Wo).

    xf    : (N, P, Mq, C)  padded, phase-decomposed, spatially flattened input
    taps  : 9 x (phase, offset) so that conv tap (i, j) for output element
            m = oy*pitch + ox is xf[n, phase, offset + m, :]
    sc_*  : phase/offset of the 1x1-stride-s "shortcut view" of the same input
    """
    N, H, W, C = x_nhwc.shape
    sh, sw = stride
    if sh not in (1, 2) or sw not in (1, 2):
        # TODO(synk): only stride components in {1, 2} are supported.
        raise NotImplementedError(f"unsupported stride {stride}")
    assert H % sh == 0 and W % sw == 0
    Ho, Wo = H // sh, W // sw
    Hq, Wq = (H + 2) // sh, (W + 2) // sw

    xp = jnp.pad(x_nhwc, ((0, 0), (1, 1), (1, 1), (0, 0)))
    if (sh, sw) == (1, 1):
        xf = xp.reshape(N, 1, Hq * Wq, C)
    else:
        phases = jnp.stack(
            [xp[:, di::sh, dj::sw, :] for di in range(sh) for dj in range(sw)],
            axis=1)
        xf = phases.reshape(N, sh * sw, Hq * Wq, C)

    taps = tuple(((i % sh) * sw + (j % sw), (i // sh) * Wq + (j // sw))
                 for i in range(3) for j in range(3))
    sc_phase = (1 % sh) * sw + (1 % sw)
    sc_off = ((1 - 1 % sh) // sh) * Wq + ((1 - 1 % sw) // sw)
    return xf, taps, Wq, (sc_phase, sc_off), Ho, Wo


# ---------------------------------------------------------------------------
# Pallas kernel: 3x3 conv (BN folded) + bias + optional ReLU  (used for stem)
# ---------------------------------------------------------------------------
def _conv_bn_act_kernel(x_ref, w_ref, b_ref, o_ref, *, taps, pitch, Ho, Wo, relu):
    # x_ref: (1, P, Mq, Cin)   flattened padded input, one batch element
    # w_ref: (9, Cin, Cout)    conv weight with BN scale folded in
    # b_ref: (1, Cout)         folded BN bias
    # o_ref: (1, Ho*Wo, Cout)  compact output
    mo = (Ho - 1) * pitch + Wo
    p0, off0 = taps[0]
    acc = jnp.dot(x_ref[0, p0, pl.ds(off0, mo), :], w_ref[0],
                  preferred_element_type=jnp.float32)
    for t in range(1, len(taps)):
        p, off = taps[t]
        acc = acc + jnp.dot(x_ref[0, p, pl.ds(off, mo), :], w_ref[t],
                            preferred_element_type=jnp.float32)
    acc = acc + b_ref[...]
    if relu:
        acc = jnp.maximum(acc, 0.0)
    for r in range(Ho):   # drop the inter-row junk columns -> compact rows
        o_ref[0, pl.ds(r * Wo, Wo), :] = (
            acc[r * pitch:r * pitch + Wo, :].astype(o_ref.dtype))


def _conv3_bn_act(x_nhwc, w, b, stride, relu=True):
    N, H, W, Cin = x_nhwc.shape
    Cout = int(w.shape[-1])
    xf, taps, pitch, _sc, Ho, Wo = _prep_conv3_input(x_nhwc, stride)
    P, Mq = int(xf.shape[1]), int(xf.shape[2])
    mo = (Ho - 1) * pitch + Wo

    kernel = functools.partial(_conv_bn_act_kernel, taps=taps, pitch=pitch,
                               Ho=Ho, Wo=Wo, relu=relu)
    flops = 2 * N * mo * Cin * Cout * len(taps)
    bytes_accessed = int(xf.size + w.size + b.size + N * Ho * Wo * Cout) * 4

    out = pl.pallas_call(
        kernel,
        out_shape=jax.ShapeDtypeStruct((N, Ho * Wo, Cout), jnp.float32),
        grid=(N,),
        in_specs=[
            pl.BlockSpec((1, P, Mq, Cin), lambda n: (n, 0, 0, 0)),
            pl.BlockSpec((len(taps), Cin, Cout), lambda n: (0, 0, 0)),
            pl.BlockSpec((1, Cout), lambda n: (0, 0)),
        ],
        out_specs=pl.BlockSpec((1, Ho * Wo, Cout), lambda n: (n, 0, 0)),
        compiler_params=pltpu.CompilerParams(
            dimension_semantics=("parallel",),
            vmem_limit_bytes=_VMEM_LIMIT),
        cost_estimate=pl.CostEstimate(flops=int(flops), transcendentals=0,
                                      bytes_accessed=bytes_accessed),
    )(xf, w, b)
    return out.reshape(N, Ho, Wo, Cout)


# ---------------------------------------------------------------------------
# Pallas kernel: one full residual basic block
#   conv1(3x3, stride s) + BN + ReLU  -> VMEM canvas
#   conv2(3x3, stride 1) + BN
#   + shortcut (identity or fused 1x1 conv + BN)
#   + ReLU
# ---------------------------------------------------------------------------
def _res_block_kernel(x_ref, w1_ref, b1_ref, w2_ref, b2_ref, *rest,
                      taps1, taps2, pitch1, sc_phase, sc_off, Ho, Wo, has_proj):
    if has_proj:
        ws_ref, bs_ref, o_ref, h_ref = rest
    else:
        o_ref, h_ref = rest

    hp = Wo + 2                       # pitch of the padded h canvas
    mo1 = (Ho - 1) * pitch1 + Wo      # conv1 / shortcut chunk length
    mo2 = (Ho - 1) * hp + Wo          # conv2 chunk length

    # --- conv1 (3x3, BN folded) + ReLU: 9 accumulated matmuls ---------------
    p0, off0 = taps1[0]
    acc1 = jnp.dot(x_ref[0, p0, pl.ds(off0, mo1), :], w1_ref[0],
                   preferred_element_type=jnp.float32)
    for t in range(1, 9):
        p, off = taps1[t]
        acc1 = acc1 + jnp.dot(x_ref[0, p, pl.ds(off, mo1), :], w1_ref[t],
                              preferred_element_type=jnp.float32)
    h1 = jnp.maximum(acc1 + b1_ref[...], 0.0)

    # --- stash h as a zero-padded canvas in VMEM (never touches HBM) --------
    h_ref[...] = jnp.zeros(h_ref.shape, h_ref.dtype)
    for r in range(Ho):
        h_ref[pl.ds((r + 1) * hp + 1, Wo), :] = (
            h1[r * pitch1:r * pitch1 + Wo, :].astype(h_ref.dtype))

    # --- conv2 (3x3, stride 1, BN folded) -----------------------------------
    acc2 = jnp.dot(h_ref[pl.ds(taps2[0], mo2), :], w2_ref[0],
                   preferred_element_type=jnp.float32)
    for t in range(1, 9):
        acc2 = acc2 + jnp.dot(h_ref[pl.ds(taps2[t], mo2), :], w2_ref[t],
                              preferred_element_type=jnp.float32)
    acc2 = acc2 + b2_ref[...]

    # --- shortcut: identity or fused 1x1 conv + BN ---------------------------
    xs = x_ref[0, sc_phase, pl.ds(sc_off, mo1), :]
    if has_proj:
        sc = jnp.dot(xs, ws_ref[0], preferred_element_type=jnp.float32) + bs_ref[...]
    else:
        sc = xs.astype(jnp.float32)

    # --- residual add + ReLU, write compact (Ho*Wo, Cout) rows ---------------
    for r in range(Ho):
        row = acc2[r * hp:r * hp + Wo, :] + sc[r * pitch1:r * pitch1 + Wo, :]
        o_ref[0, pl.ds(r * Wo, Wo), :] = jnp.maximum(row, 0.0).astype(o_ref.dtype)


def _res_block(x_nhwc, blk):
    N, H, W, Cin = x_nhwc.shape
    stride = blk["stride"]
    w1, b1 = blk["conv1"]["w"], blk["conv1"]["b"]
    w2, b2 = blk["conv2"]["w"], blk["conv2"]["b"]
    Cout = int(w1.shape[-1])
    has_proj = "short" in blk
    if not has_proj:
        assert Cin == Cout and stride == (1, 1)

    xf, taps1, pitch1, (sc_phase, sc_off), Ho, Wo = _prep_conv3_input(x_nhwc, stride)
    P, Mq = int(xf.shape[1]), int(xf.shape[2])
    hp = Wo + 2
    taps2 = tuple(i * hp + j for i in range(3) for j in range(3))
    mo1 = (Ho - 1) * pitch1 + Wo
    mo2 = (Ho - 1) * hp + Wo

    kernel = functools.partial(
        _res_block_kernel, taps1=taps1, taps2=taps2, pitch1=pitch1,
        sc_phase=sc_phase, sc_off=sc_off, Ho=Ho, Wo=Wo, has_proj=has_proj)

    inputs = [xf, w1, b1, w2, b2]
    in_specs = [
        pl.BlockSpec((1, P, Mq, Cin), lambda n: (n, 0, 0, 0)),
        pl.BlockSpec((9, Cin, Cout), lambda n: (0, 0, 0)),
        pl.BlockSpec((1, Cout), lambda n: (0, 0)),
        pl.BlockSpec((9, Cout, Cout), lambda n: (0, 0, 0)),
        pl.BlockSpec((1, Cout), lambda n: (0, 0)),
    ]
    flops = 2 * N * (mo1 * Cin + mo2 * Cout) * Cout * 9
    if has_proj:
        ws, bs = blk["short"]["w"], blk["short"]["b"]
        inputs += [ws, bs]
        in_specs += [
            pl.BlockSpec((1, Cin, Cout), lambda n: (0, 0, 0)),
            pl.BlockSpec((1, Cout), lambda n: (0, 0)),
        ]
        flops += 2 * N * mo1 * Cin * Cout
    bytes_accessed = int(sum(int(a.size) for a in inputs) + N * Ho * Wo * Cout) * 4

    out = pl.pallas_call(
        kernel,
        out_shape=jax.ShapeDtypeStruct((N, Ho * Wo, Cout), jnp.float32),
        grid=(N,),
        in_specs=in_specs,
        out_specs=pl.BlockSpec((1, Ho * Wo, Cout), lambda n: (n, 0, 0)),
        scratch_shapes=[pltpu.VMEM(((Ho + 2) * hp, Cout), jnp.float32)],
        compiler_params=pltpu.CompilerParams(
            dimension_semantics=("parallel",),
            vmem_limit_bytes=_VMEM_LIMIT),
        cost_estimate=pl.CostEstimate(flops=int(flops), transcendentals=0,
                                      bytes_accessed=bytes_accessed),
    )(*inputs)
    return out.reshape(N, Ho, Wo, Cout)


# ---------------------------------------------------------------------------
# Deterministic synthetic parameters (no checkpoint loading).
# BN (eval mode) is folded into the conv weight:
#   scale = gamma / sqrt(running_var + eps);  bias = beta - scale*running_mean
# ---------------------------------------------------------------------------
def _conv_bn_params(key, ksize, cin, cout):
    k1, k2, k3 = jax.random.split(key, 3)
    fan_in = ksize * ksize * cin
    w = jax.random.normal(k1, (ksize, ksize, cin, cout), jnp.float32) * (2.0 / fan_in) ** 0.5
    gamma = 1.0 + 0.1 * jax.random.normal(k2, (cout,), jnp.float32)
    beta = 0.1 * jax.random.normal(k3, (cout,), jnp.float32)
    running_mean = jnp.zeros((cout,), jnp.float32)
    running_var = jnp.ones((cout,), jnp.float32)
    scale = gamma / jnp.sqrt(running_var + _BN_EPS)
    bias = beta - scale * running_mean
    w_folded = (w * scale).reshape(ksize * ksize, cin, cout)
    return {"w": w_folded, "b": bias.reshape(1, cout)}


class NekoCCOFeatureExtractor2Thicc:
    """JAX/Pallas analogue of neko_cco_Feature_Extractor2_thicc (forward only)."""

    def __init__(self, strides, compress_layer, input_shape,
                 hardness=2, oupch=32, key=None):
        assert len(strides) == 6, "expect 6 stride entries: stem + 5 stages"
        if key is None:
            key = jax.random.PRNGKey(0)
        self.input_shape = tuple(input_shape)
        self.strides = [(s, s) if isinstance(s, int) else tuple(s) for s in strides]
        self.compress_layer = compress_layer  # TODO(synk): compress_layer variant not modeled
        inpch = input_shape[0]

        base = 8  # scaled-down "thicc" width for the synthetic demo
        stage_ch = [base, 2 * base, 4 * base, 4 * base, oupch]
        blocks_per_stage = max(1, int(hardness))

        keys = jax.random.split(key, 1 + 5 * blocks_per_stage * 3)
        ki = iter(range(len(keys)))

        # Stem: conv3x3 + BN + ReLU
        self.stem = _conv_bn_params(keys[next(ki)], 3, inpch, base)

        # 5 residual stages
        self.stages = []
        cin = base
        for s in range(5):
            cout = stage_ch[s]
            blocks = []
            for b in range(blocks_per_stage):
                stride = self.strides[s + 1] if b == 0 else (1, 1)
                blk = {
                    "conv1": _conv_bn_params(keys[next(ki)], 3, cin, cout),
                    "conv2": _conv_bn_params(keys[next(ki)], 3, cout, cout),
                    "stride": stride,
                }
                if stride != (1, 1) or cin != cout:
                    blk["short"] = _conv_bn_params(keys[next(ki)], 1, cin, cout)
                else:
                    _ = keys[next(ki)]  # keep key consumption deterministic
                blocks.append(blk)
                cin = cout
            self.stages.append(blocks)

    def __call__(self, x_nchw, debug=False):
        # layout: NCHW in -> NHWC internally -> NCHW out
        x = jnp.transpose(x_nchw.astype(jnp.float32), (0, 2, 3, 1))
        x = _conv3_bn_act(x, self.stem["w"], self.stem["b"], self.strides[0], relu=True)

        features = []
        tmp_shape = x.shape[1:3]
        for s, blocks in enumerate(self.stages):
            for blk in blocks:
                x = _res_block(x, blk)
            if s == len(self.stages) - 1:
                features.append(x)
            elif x.shape[1:3] != tmp_shape:
                tmp_shape = x.shape[1:3]
                features.append(x)

        feats_nchw = [jnp.transpose(f, (0, 3, 1, 2)) for f in features]
        # TODO(synk): lens "grid" output only needed when debug=True; omitted.
        return feats_nchw

    def Iwantshapes(self):
        pseudo = jnp.zeros((1,) + tuple(self.input_shape), jnp.float32)
        return [f.shape[1:] for f in self(pseudo)]


if __name__ == "__main__":
    key = jax.random.PRNGKey(0)
    k_param, k_data = jax.random.split(key)

    input_shape = (4, 16, 16)  # (C, H, W)
    strides = [(1, 1), (2, 2), (1, 1), (2, 2), (1, 1), (1, 1)]

    model = NekoCCOFeatureExtractor2Thicc(
        strides, compress_layer=False, input_shape=input_shape,
        hardness=2, oupch=32, key=k_param)

    x = jax.random.normal(k_data, (2,) + input_shape, jnp.float32)  # NCHW

    feats = model(x)
    for f in feats:
        jax.block_until_ready(f)

    # Expected pyramid for base=8, oupch=32, the strides above and hardness=2:
    #   stage0 downsamples 16x16 -> 8x8 (8 ch), stage2 -> 4x4 (32 ch), final 4x4 (32 ch)
    assert len(feats) == 3
    assert feats[0].shape == (2, 8, 8, 8)
    assert feats[1].shape == (2, 32, 4, 4)
    assert feats[2].shape == (2, 32, 4, 4)
    assert all(bool(jnp.all(jnp.isfinite(f))) for f in feats)

    print("KERNEL_OK")
</pallas_src>

<mosaic_0001>
module attributes {stable_mosaic.version = 11 : i64} {
  func.func @_conv_bn_act_kernel(%arg0: i32, %arg1: memref<1x1x324x4xf32, #tpu.memory_space<vmem>>, %arg2: memref<9x4x8xf32, #tpu.memory_space<vmem>>, %arg3: memref<1x8xf32, #tpu.memory_space<vmem>>, %arg4: memref<1x256x8xf32, #tpu.memory_space<vmem>>) attributes {dimension_semantics = [#tpu.dimension_semantics<parallel>], iteration_bounds = array<i64: 2>, scalar_prefetch = 0 : i64, scratch_operands = 0 : i64, tpu.core_type = #tpu.core_type<tc>, window_params = [{transform_indices = @transform_0, window_bounds = array<i64: 1, 1, 324, 4>}, {pipeline_mode = #tpu.pipeline_mode<synchronous>, transform_indices = @transform_1, window_bounds = array<i64: 9, 4, 8>}, {pipeline_mode = #tpu.pipeline_mode<synchronous>, transform_indices = @transform_2, window_bounds = array<i64: 1, 8>}, {transform_indices = @transform_3, window_bounds = array<i64: 1, 256, 8>}]} {
    %c0 = arith.constant 0 : index
    %c0_0 = arith.constant 0 : index
    %c0_1 = arith.constant 0 : index
    %c0_2 = arith.constant 0 : index
    %0 = vector.load %arg1[%c0, %c0_0, %c0_1, %c0_2] : memref<1x1x324x4xf32, #tpu.memory_space<vmem>>, vector<1x1x286x4xf32>
    %1 = vector.shape_cast %0 : vector<1x1x286x4xf32> to vector<286x4xf32>
    %c0_3 = arith.constant 0 : index
    %c0_4 = arith.constant 0 : index
    %c0_5 = arith.constant 0 : index
    %2 = vector.load %arg2[%c0_3, %c0_4, %c0_5] : memref<9x4x8xf32, #tpu.memory_space<vmem>>, vector<1x4x8xf32>
    %3 = vector.shape_cast %2 : vector<1x4x8xf32> to vector<4x8xf32>
    %cst = arith.constant dense<0.000000e+00> : vector<286x8xf32>
    %4 = tpu.matmul %1, %3, %cst {dimension_numbers = #tpu.dot_dimension_numbers<[1], [0], [0], [1], [0, 0, 1, 1], [], []>} : vector<286x4xf32>, vector<4x8xf32>, vector<286x8xf32> -> vector<286x8xf32>
    %c0_6 = arith.constant 0 : index
    %c0_7 = arith.constant 0 : index
    %c1 = arith.constant 1 : index
    %c0_8 = arith.constant 0 : index
    %5 = vector.load %arg1[%c0_6, %c0_7, %c1, %c0_8] : memref<1x1x324x4xf32, #tpu.memory_space<vmem>>, vector<1x1x286x4xf32>
    %6 = vector.shape_cast %5 : vector<1x1x286x4xf32> to vector<286x4xf32>
    %c1_9 = arith.constant 1 : index
    %c0_10 = arith.constant 0 : index
    %c0_11 = arith.constant 0 : index
    %7 = vector.load %arg2[%c1_9, %c0_10, %c0_11] : memref<9x4x8xf32, #tpu.memory_space<vmem>>, vector<1x4x8xf32>
    %8 = vector.shape_cast %7 : vector<1x4x8xf32> to vector<4x8xf32>
    %cst_12 = arith.constant dense<0.000000e+00> : vector<286x8xf32>
    %9 = tpu.matmul %6, %8, %cst_12 {dimension_numbers = #tpu.dot_dimension_numbers<[1], [0], [0], [1], [0, 0, 1, 1], [], []>} : vector<286x4xf32>, vector<4x8xf32>, vector<286x8xf32> -> vector<286x8xf32>
    %10 = arith.addf %4, %9 : vector<286x8xf32>
    %c0_13 = arith.constant 0 : index
    %c0_14 = arith.constant 0 : index
    %c2 = arith.constant 2 : index
    %c0_15 = arith.constant 0 : index
    %11 = vector.load %arg1[%c0_13, %c0_14, %c2, %c0_15] : memref<1x1x324x4xf32, #tpu.memory_space<vmem>>, vector<1x1x286x4xf32>
    %12 = vector.shape_cast %11 : vector<1x1x286x4xf32> to vector<286x4xf32>
    %c2_16 = arith.constant 2 : index
    %c0_17 = arith.constant 0 : index
    %c0_18 = arith.constant 0 : index
    %13 = vector.load %arg2[%c2_16, %c0_17, %c0_18] : memref<9x4x8xf32, #tpu.memory_space<vmem>>, vector<1x4x8xf32>
    %14 = vector.shape_cast %13 : vector<1x4x8xf32> to vector<4x8xf32>
    %cst_19 = arith.constant dense<0.000000e+00> : vector<286x8xf32>
    %15 = tpu.matmul %12, %14, %cst_19 {dimension_numbers = #tpu.dot_dimension_numbers<[1], [0], [0], [1], [0, 0, 1, 1], [], []>} : vector<286x4xf32>, vector<4x8xf32>, vector<286x8xf32> -> vector<286x8xf32>
    %16 = arith.addf %10, %15 : vector<286x8xf32>
    %c0_20 = arith.constant 0 : index
    %c0_21 = arith.constant 0 : index
    %c18 = arith.constant 18 : index
    %c0_22 = arith.constant 0 : index
    %17 = vector.load %arg1[%c0_20, %c0_21, %c18, %c0_22] : memref<1x1x324x4xf32, #tpu.memory_space<vmem>>, vector<1x1x286x4xf32>
    %18 = vector.shape_cast %17 : vector<1x1x286x4xf32> to vector<286x4xf32>
    %c3 = arith.constant 3 : index
    %c0_23 = arith.constant 0 : index
    %c0_24 = arith.constant 0 : index
    %19 = vector.load %arg2[%c3, %c0_23, %c0_24] : memref<9x4x8xf32, #tpu.memory_space<vmem>>, vector<1x4x8xf32>
    %20 = vector.shape_cast %19 : vector<1x4x8xf32> to vector<4x8xf32>
    %cst_25 = arith.constant dense<0.000000e+00> : vector<286x8xf32>
    %21 = tpu.matmul %18, %20, %cst_25 {dimension_numbers = #tpu.dot_dimension_numbers<[1], [0], [0], [1], [0, 0, 1, 1], [], []>} : vector<286x4xf32>, vector<4x8xf32>, vector<286x8xf32> -> vector<286x8xf32>
    %22 = arith.addf %16, %21 : vector<286x8xf32>
    %c0_26 = arith.constant 0 : index
    %c0_27 = arith.constant 0 : index
    %c19 = arith.constant 19 : index
    %c0_28 = arith.constant 0 : index
    %23 = vector.load %arg1[%c0_26, %c0_27, %c19, %c0_28] : memref<1x1x324x4xf32, #tpu.memory_space<vmem>>, vector<1x1x286x4xf32>
    %24 = vector.shape_cast %23 : vector<1x1x286x4xf32> to vector<286x4xf32>
    %c4 = arith.constant 4 : index
    %c0_29 = arith.constant 0 : index
    %c0_30 = arith.constant 0 : index
    %25 = vector.load %arg2[%c4, %c0_29, %c0_30] : memref<9x4x8xf32, #tpu.memory_space<vmem>>, vector<1x4x8xf32>
    %26 = vector.shape_cast %25 : vector<1x4x8xf32> to vector<4x8xf32>
    %cst_31 = arith.constant dense<0.000000e+00> : vector<286x8xf32>
    %27 = tpu.matmul %24, %26, %cst_31 {dimension_numbers = #tpu.dot_dimension_numbers<[1], [0], [0], [1], [0, 0, 1, 1], [], []>} : vector<286x4xf32>, vector<4x8xf32>, vector<286x8xf32> -> vector<286x8xf32>
    %28 = arith.addf %22, %27 : vector<286x8xf32>
    %c0_32 = arith.constant 0 : index
    %c0_33 = arith.constant 0 : index
    %c20 = arith.constant 20 : index
    %c0_34 = arith.constant 0 : index
    %29 = vector.load %arg1[%c0_32, %c0_33, %c20, %c0_34] : memref<1x1x324x4xf32, #tpu.memory_space<vmem>>, vector<1x1x286x4xf32>
    %30 = vector.shape_cast %29 : vector<1x1x286x4xf32> to vector<286x4xf32>
    %c5 = arith.constant 5 : index
    %c0_35 = arith.constant 0 : index
    %c0_36 = arith.constant 0 : index
    %31 = vector.load %arg2[%c5, %c0_35, %c0_36] : memref<9x4x8xf32, #tpu.memory_space<vmem>>, vector<1x4x8xf32>
    %32 = vector.shape_cast %31 : vector<1x4x8xf32> to vector<4x8xf32>
    %cst_37 = arith.constant dense<0.000000e+00> : vector<286x8xf32>
    %33 = tpu.matmul %30, %32, %cst_37 {dimension_numbers = #tpu.dot_dimension_numbers<[1], [0], [0], [1], [0, 0, 1, 1], [], []>} : vector<286x4xf32>, vector<4x8xf32>, vector<286x8xf32> -> vector<286x8xf32>
    %34 = arith.addf %28, %33 : vector<286x8xf32>
    %c0_38 = arith.constant 0 : index
    %c0_39 = arith.constant 0 : index
    %c36 = arith.constant 36 : index
    %c0_40 = arith.constant 0 : index
    %35 = vector.load %arg1[%c0_38, %c0_39, %c36, %c0_40] : memref<1x1x324x4xf32, #tpu.memory_space<vmem>>, vector<1x1x286x4xf32>
    %36 = vector.shape_cast %35 : vector<1x1x286x4xf32> to vector<286x4xf32>
    %c6 = arith.constant 6 : index
    %c0_41 = arith.constant 0 : index
    %c0_42 = arith.constant 0 : index
    %37 = vector.load %arg2[%c6, %c0_41, %c0_42] : memref<9x4x8xf32, #tpu.memory_space<vmem>>, vector<1x4x8xf32>
    %38 = vector.shape_cast %37 : vector<1x4x8xf32> to vector<4x8xf32>
    %cst_43 = arith.constant dense<0.000000e+00> : vector<286x8xf32>
    %39 = tpu.matmul %36, %38, %cst_43 {dimension_numbers = #tpu.dot_dimension_numbers<[1], [0], [0], [1], [0, 0, 1, 1], [], []>} : vector<286x4xf32>, vector<4x8xf32>, vector<286x8xf32> -> vector<286x8xf32>
    %40 = arith.addf %34, %39 : vector<286x8xf32>
    %c0_44 = arith.constant 0 : index
    %c0_45 = arith.constant 0 : index
    %c37 = arith.constant 37 : index
    %c0_46 = arith.constant 0 : index
    %41 = vector.load %arg1[%c0_44, %c0_45, %c37, %c0_46] : memref<1x1x324x4xf32, #tpu.memory_space<vmem>>, vector<1x1x286x4xf32>
    %42 = vector.shape_cast %41 : vector<1x1x286x4xf32> to vector<286x4xf32>
    %c7 = arith.constant 7 : index
    %c0_47 = arith.constant 0 : index
    %c0_48 = arith.constant 0 : index
    %43 = vector.load %arg2[%c7, %c0_47, %c0_48] : memref<9x4x8xf32, #tpu.memory_space<vmem>>, vector<1x4x8xf32>
    %44 = vector.shape_cast %43 : vector<1x4x8xf32> to vector<4x8xf32>
    %cst_49 = arith.constant dense<0.000000e+00> : vector<286x8xf32>
    %45 = tpu.matmul %42, %44, %cst_49 {dimension_numbers = #tpu.dot_dimension_numbers<[1], [0], [0], [1], [0, 0, 1, 1], [], []>} : vector<286x4xf32>, vector<4x8xf32>, vector<286x8xf32> -> vector<286x8xf32>
    %46 = arith.addf %40, %45 : vector<286x8xf32>
    %c0_50 = arith.constant 0 : index
    %c0_51 = arith.constant 0 : index
    %c38 = arith.constant 38 : index
    %c0_52 = arith.constant 0 : index
    %47 = vector.load %arg1[%c0_50, %c0_51, %c38, %c0_52] : memref<1x1x324x4xf32, #tpu.memory_space<vmem>>, vector<1x1x286x4xf32>
    %48 = vector.shape_cast %47 : vector<1x1x286x4xf32> to vector<286x4xf32>
    %c8 = arith.constant 8 : index
    %c0_53 = arith.constant 0 : index
    %c0_54 = arith.constant 0 : index
    %49 = vector.load %arg2[%c8, %c0_53, %c0_54] : memref<9x4x8xf32, #tpu.memory_space<vmem>>, vector<1x4x8xf32>
    %50 = vector.shape_cast %49 : vector<1x4x8xf32> to vector<4x8xf32>
    %cst_55 = arith.constant dense<0.000000e+00> : vector<286x8xf32>
    %51 = tpu.matmul %48, %50, %cst_55 {dimension_numbers = #tpu.dot_dimension_numbers<[1], [0], [0], [1], [0, 0, 1, 1], [], []>} : vector<286x4xf32>, vector<4x8xf32>, vector<286x8xf32> -> vector<286x8xf32>
    %52 = arith.addf %46, %51 : vector<286x8xf32>
    %c0_56 = arith.constant 0 : index
    %c0_57 = arith.constant 0 : index
    %53 = vector.load %arg3[%c0_56, %c0_57] : memref<1x8xf32, #tpu.memory_space<vmem>>, vector<1x8xf32>
    %54 = vector.broadcast %53 : vector<1x8xf32> to vector<286x8xf32>
    %55 = arith.addf %52, %54 : vector<286x8xf32>
    %cst_58 = arith.constant 0.000000e+00 : f32
    %56 = vector.broadcast %cst_58 : f32 to vector<286x8xf32>
    %57 = arith.maximumf %55, %56 : vector<286x8xf32>
    %58 = vector.extract_strided_slice %57 {offsets = [0, 0], sizes = [16, 8], strides = [1, 1]} : vector<286x8xf32> to vector<16x8xf32>
    %c0_59 = arith.constant 0 : index
    %c0_60 = arith.constant 0 : index
    %c0_61 = arith.constant 0 : index
    %59 = vector.load %arg4[%c0_59, %c0_60, %c0_61] : memref<1x256x8xf32, #tpu.memory_space<vmem>>, vector<1x16x8xf32>
    %60 = vector.shape_cast %59 : vector<1x16x8xf32> to vector<16x8xf32>
    %61 = vector.shape_cast %58 : vector<16x8xf32> to vector<1x16x8xf32>
    tpu.vector_store %arg4[%c0_59, %c0_60, %c0_61], %61 {strides = array<i32>} : memref<1x256x8xf32, #tpu.memory_space<vmem>>, vector<1x16x8xf32>,
    %62 = vector.extract_strided_slice %57 {offsets = [18, 0], sizes = [16, 8], strides = [1, 1]} : vector<286x8xf32> to vector<16x8xf32>
    %c0_62 = arith.constant 0 : index
    %c16 = arith.constant 16 : index
    %c0_63 = arith.constant 0 : index
    %63 = vector.load %arg4[%c0_62, %c16, %c0_63] : memref<1x256x8xf32, #tpu.memory_space<vmem>>, vector<1x16x8xf32>
    %64 = vector.shape_cast %63 : vector<1x16x8xf32> to vector<16x8xf32>
    %65 = vector.shape_cast %62 : vector<16x8xf32> to vector<1x16x8xf32>
    tpu.vector_store %arg4[%c0_62, %c16, %c0_63], %65 {strides = array<i32>} : memref<1x256x8xf32, #tpu.memory_space<vmem>>, vector<1x16x8xf32>,
    %66 = vector.extract_strided_slice %57 {offsets = [36, 0], sizes = [16, 8], strides = [1, 1]} : vector<286x8xf32> to vector<16x8xf32>
    %c0_64 = arith.constant 0 : index
    %c32 = arith.constant 32 : index
    %c0_65 = arith.constant 0 : index
    %67 = vector.load %arg4[%c0_64, %c32, %c0_65] : memref<1x256x8xf32, #tpu.memory_space<vmem>>, vector<1x16x8xf32>
    %68 = vector.shape_cast %67 : vector<1x16x8xf32> to vector<16x8xf32>
    %69 = vector.shape_cast %66 : vector<16x8xf32> to vector<1x16x8xf32>
    tpu.vector_store %arg4[%c0_64, %c32, %c0_65], %69 {strides = array<i32>} : memref<1x256x8xf32, #tpu.memory_space<vmem>>, vector<1x16x8xf32>,
    %70 = vector.extract_strided_slice %57 {offsets = [54, 0], sizes = [16, 8], strides = [1, 1]} : vector<286x8xf32> to vector<16x8xf32>
    %c0_66 = arith.constant 0 : index
    %c48 = arith.constant 48 : index
    %c0_67 = arith.constant 0 : index
    %71 = vector.load %arg4[%c0_66, %c48, %c0_67] : memref<1x256x8xf32, #tpu.memory_space<vmem>>, vector<1x16x8xf32>
    %72 = vector.shape_cast %71 : vector<1x16x8xf32> to vector<16x8xf32>
    %73 = vector.shape_cast %70 : vector<16x8xf32> to vector<1x16x8xf32>
    tpu.vector_store %arg4[%c0_66, %c48, %c0_67], %73 {strides = array<i32>} : memref<1x256x8xf32, #tpu.memory_space<vmem>>, vector<1x16x8xf32>,
    %74 = vector.extract_strided_slice %57 {offsets = [72, 0], sizes = [16, 8], strides = [1, 1]} : vector<286x8xf32> to vector<16x8xf32>
    %c0_68 = arith.constant 0 : index
    %c64 = arith.constant 64 : index
    %c0_69 = arith.constant 0 : index
    %75 = vector.load %arg4[%c0_68, %c64, %c0_69] : memref<1x256x8xf32, #tpu.memory_space<vmem>>, vector<1x16x8xf32>
    %76 = vector.shape_cast %75 : vector<1x16x8xf32> to vector<16x8xf32>
    %77 = vector.shape_cast %74 : vector<16x8xf32> to vector<1x16x8xf32>
    tpu.vector_store %arg4[%c0_68, %c64, %c0_69], %77 {strides = array<i32>} : memref<1x256x8xf32, #tpu.memory_space<vmem>>, vector<1x16x8xf32>,
    %78 = vector.extract_strided_slice %57 {offsets = [90, 0], sizes = [16, 8], strides = [1, 1]} : vector<286x8xf32> to vector<16x8xf32>
    %c0_70 = arith.constant 0 : index
    %c80 = arith.constant 80 : index
    %c0_71 = arith.constant 0 : index
    %79 = vector.load %arg4[%c0_70, %c80, %c0_71] : memref<1x256x8xf32, #tpu.memory_space<vmem>>, vector<1x16x8xf32>
    %80 = vector.shape_cast %79 : vector<1x16x8xf32> to vector<16x8xf32>
    %81 = vector.shape_cast %78 : vector<16x8xf32> to vector<1x16x8xf32>
    tpu.vector_store %arg4[%c0_70, %c80, %c0_71], %81 {strides = array<i32>} : memref<1x256x8xf32, #tpu.memory_space<vmem>>, vector<1x16x8xf32>,
    %82 = vector.extract_strided_slice %57 {offsets = [108, 0], sizes = [16, 8], strides = [1, 1]} : vector<286x8xf32> to vector<16x8xf32>
    %c0_72 = arith.constant 0 : index
    %c96 = arith.constant 96 : index
    %c0_73 = arith.constant 0 : index
    %83 = vector.load %arg4[%c0_72, %c96, %c0_73] : memref<1x256x8xf32, #tpu.memory_space<vmem>>, vector<1x16x8xf32>
    %84 = vector.shape_cast %83 : vector<1x16x8xf32> to vector<16x8xf32>
    %85 = vector.shape_cast %82 : vector<16x8xf32> to vector<1x16x8xf32>
    tpu.vector_store %arg4[%c0_72, %c96, %c0_73], %85 {strides = array<i32>} : memref<1x256x8xf32, #tpu.memory_space<vmem>>, vector<1x16x8xf32>,
    %86 = vector.extract_strided_slice %57 {offsets = [126, 0], sizes = [16, 8], strides = [1, 1]} : vector<286x8xf32> to vector<16x8xf32>
    %c0_74 = arith.constant 0 : index
    %c112 = arith.constant 112 : index
    %c0_75 = arith.constant 0 : index
    %87 = vector.load %arg4[%c0_74, %c112, %c0_75] : memref<1x256x8xf32, #tpu.memory_space<vmem>>, vector<1x16x8xf32>
    %88 = vector.shape_cast %87 : vector<1x16x8xf32> to vector<16x8xf32>
    %89 = vector.shape_cast %86 : vector<16x8xf32> to vector<1x16x8xf32>
    tpu.vector_store %arg4[%c0_74, %c112, %c0_75], %89 {strides = array<i32>} : memref<1x256x8xf32, #tpu.memory_space<vmem>>, vector<1x16x8xf32>,
    %90 = vector.extract_strided_slice %57 {offsets = [144, 0], sizes = [16, 8], strides = [1, 1]} : vector<286x8xf32> to vector<16x8xf32>
    %c0_76 = arith.constant 0 : index
    %c128 = arith.constant 128 : index
    %c0_77 = arith.constant 0 : index
    %91 = vector.load %arg4[%c0_76, %c128, %c0_77] : memref<1x256x8xf32, #tpu.memory_space<vmem>>, vector<1x16x8xf32>
    %92 = vector.shape_cast %91 : vector<1x16x8xf32> to vector<16x8xf32>
    %93 = vector.shape_cast %90 : vector<16x8xf32> to vector<1x16x8xf32>
    tpu.vector_store %arg4[%c0_76, %c128, %c0_77], %93 {strides = array<i32>} : memref<1x256x8xf32, #tpu.memory_space<vmem>>, vector<1x16x8xf32>,
    %94 = vector.extract_strided_slice %57 {offsets = [162, 0], sizes = [16, 8], strides = [1, 1]} : vector<286x8xf32> to vector<16x8xf32>
    %c0_78 = arith.constant 0 : index
    %c144 = arith.constant 144 : index
    %c0_79 = arith.constant 0 : index
    %95 = vector.load %arg4[%c0_78, %c144, %c0_79] : memref<1x256x8xf32, #tpu.memory_space<vmem>>, vector<1x16x8xf32>
    %96 = vector.shape_cast %95 : vector<1x16x8xf32> to vector<16x8xf32>
    %97 = vector.shape_cast %94 : vector<16x8xf32> to vector<1x16x8xf32>
    tpu.vector_store %arg4[%c0_78, %c144, %c0_79], %97 {strides = array<i32>} : memref<1x256x8xf32, #tpu.memory_space<vmem>>, vector<1x16x8xf32>,
    %98 = vector.extract_strided_slice %57 {offsets = [180, 0], sizes = [16, 8], strides = [1, 1]} : vector<286x8xf32> to vector<16x8xf32>
    %c0_80 = arith.constant 0 : index
    %c160 = arith.constant 160 : index
    %c0_81 = arith.constant 0 : index
    %99 = vector.load %arg4[%c0_80, %c160, %c0_81] : memref<1x256x8xf32, #tpu.memory_space<vmem>>, vector<1x16x8xf32>
    %100 = vector.shape_cast %99 : vector<1x16x8xf32> to vector<16x8xf32>
    %101 = vector.shape_cast %98 : vector<16x8xf32> to vector<1x16x8xf32>
    tpu.vector_store %arg4[%c0_80, %c160, %c0_81], %101 {strides = array<i32>} : memref<1x256x8xf32, #tpu.memory_space<vmem>>, vector<1x16x8xf32>,
    %102 = vector.extract_strided_slice %57 {offsets = [198, 0], sizes = [16, 8], strides = [1, 1]} : vector<286x8xf32> to vector<16x8xf32>
    %c0_82 = arith.constant 0 : index
    %c176 = arith.constant 176 : index
    %c0_83 = arith.constant 0 : index
    %103 = vector.load %arg4[%c0_82, %c176, %c0_83] : memref<1x256x8xf32, #tpu.memory_space<vmem>>, vector<1x16x8xf32>
    %104 = vector.shape_cast %103 : vector<1x16x8xf32> to vector<16x8xf32>
    %105 = vector.shape_cast %102 : vector<16x8xf32> to vector<1x16x8xf32>
    tpu.vector_store %arg4[%c0_82, %c176, %c0_83], %105 {strides = array<i32>} : memref<1x256x8xf32, #tpu.memory_space<vmem>>, vector<1x16x8xf32>,
    %106 = vector.extract_strided_slice %57 {offsets = [216, 0], sizes = [16, 8], strides = [1, 1]} : vector<286x8xf32> to vector<16x8xf32>
    %c0_84 = arith.constant 0 : index
    %c192 = arith.constant 192 : index
    %c0_85 = arith.constant 0 : index
    %107 = vector.load %arg4[%c0_84, %c192, %c0_85] : memref<1x256x8xf32, #tpu.memory_space<vmem>>, vector<1x16x8xf32>
    %108 = vector.shape_cast %107 : vector<1x16x8xf32> to vector<16x8xf32>
    %109 = vector.shape_cast %106 : vector<16x8xf32> to vector<1x16x8xf32>
    tpu.vector_store %arg4[%c0_84, %c192, %c0_85], %109 {strides = array<i32>} : memref<1x256x8xf32, #tpu.memory_space<vmem>>, vector<1x16x8xf32>,
    %110 = vector.extract_strided_slice %57 {offsets = [234, 0], sizes = [16, 8], strides = [1, 1]} : vector<286x8xf32> to vector<16x8xf32>
    %c0_86 = arith.constant 0 : index
    %c208 = arith.constant 208 : index
    %c0_87 = arith.constant 0 : index
    %111 = vector.load %arg4[%c0_86, %c208, %c0_87] : memref<1x256x8xf32, #tpu.memory_space<vmem>>, vector<1x16x8xf32>
    %112 = vector.shape_cast %111 : vector<1x16x8xf32> to vector<16x8xf32>
    %113 = vector.shape_cast %110 : vector<16x8xf32> to vector<1x16x8xf32>
    tpu.vector_store %arg4[%c0_86, %c208, %c0_87], %113 {strides = array<i32>} : memref<1x256x8xf32, #tpu.memory_space<vmem>>, vector<1x16x8xf32>,
    %114 = vector.extract_strided_slice %57 {offsets = [252, 0], sizes = [16, 8], strides = [1, 1]} : vector<286x8xf32> to vector<16x8xf32>
    %c0_88 = arith.constant 0 : index
    %c224 = arith.constant 224 : index
    %c0_89 = arith.constant 0 : index
    %115 = vector.load %arg4[%c0_88, %c224, %c0_89] : memref<1x256x8xf32, #tpu.memory_space<vmem>>, vector<1x16x8xf32>
    %116 = vector.shape_cast %115 : vector<1x16x8xf32> to vector<16x8xf32>
    %117 = vector.shape_cast %114 : vector<16x8xf32> to vector<1x16x8xf32>
    tpu.vector_store %arg4[%c0_88, %c224, %c0_89], %117 {strides = array<i32>} : memref<1x256x8xf32, #tpu.memory_space<vmem>>, vector<1x16x8xf32>,
    %118 = vector.extract_strided_slice %57 {offsets = [270, 0], sizes = [16, 8], strides = [1, 1]} : vector<286x8xf32> to vector<16x8xf32>
    %c0_90 = arith.constant 0 : index
    %c240 = arith.constant 240 : index
    %c0_91 = arith.constant 0 : index
    %119 = vector.load %arg4[%c0_90, %c240, %c0_91] : memref<1x256x8xf32, #tpu.memory_space<vmem>>, vector<1x16x8xf32>
    %120 = vector.shape_cast %119 : vector<1x16x8xf32> to vector<16x8xf32>
    %121 = vector.shape_cast %118 : vector<16x8xf32> to vector<1x16x8xf32>
    tpu.vector_store %arg4[%c0_90, %c240, %c0_91], %121 {strides = array<i32>} : memref<1x256x8xf32, #tpu.memory_space<vmem>>, vector<1x16x8xf32>,
    return
  }
  func.func @transform_0(%arg0: i32) -> (i32, i32, i32, i32) {
    %c0_i32 = arith.constant 0 : i32
    %c0_i32_0 = arith.constant 0 : i32
    %c0_i32_1 = arith.constant 0 : i32
    %c0_i32_2 = arith.constant 0 : i32
    return %arg0, %c0_i32, %c0_i32_0, %c0_i32_1 : i32, i32, i32, i32
  }
  func.func @transform_1(%arg0: i32) -> (i32, i32, i32) {
    %c0_i32 = arith.constant 0 : i32
    %c0_i32_0 = arith.constant 0 : i32
    %c0_i32_1 = arith.constant 0 : i32
    %c0_i32_2 = arith.constant 0 : i32
    return %c0_i32, %c0_i32_0, %c0_i32_1 : i32, i32, i32
  }
  func.func @transform_2(%arg0: i32) -> (i32, i32) {
    %c0_i32 = arith.constant 0 : i32
    %c0_i32_0 = arith.constant 0 : i32
    %c0_i32_1 = arith.constant 0 : i32
    return %c0_i32, %c0_i32_0 : i32, i32
  }
  func.func @transform_3(%arg0: i32) -> (i32, i32, i32) {
    %c0_i32 = arith.constant 0 : i32
    %c0_i32_0 = arith.constant 0 : i32
    %c0_i32_1 = arith.constant 0 : i32
    return %arg0, %c0_i32, %c0_i32_0 : i32, i32, i32
  }
}

</mosaic_0001>

<bundles_post_ra>
// kernel: tpu_custom_call.1
= control target key start
LH: loop header
LB: loop body
LE: loop exit
PB: predicated region body
PF: predicated region fallthrough
CT: control target
= control target key end

     0   :  { %s5672_s12 = smov 0   ;;  %s6769_s0 = inlined_call_operand.vmem [shape: f32[2,1,324,4], index: 0, kind: input, shape index: {}]   ;;  %s6770_s1 = inlined_call_operand.vmem [shape: f32[9,4,8], index: 1, kind: input, shape index: {}]   ;;  %s6771_s2 = inlined_call_operand.vmem [shape: f32[1,8], index: 2, kind: input, shape index: {}]   ;;  %s6772_s3 = inlined_call_operand.vmem [shape: f32[2,256,8], index: 3, kind: output, shape index: {}]  }
   0x1 LB: > { %s4155_s13 = sadd.s32 4294967295, %s5650_s12   ;;  %p4159_p0 = scmp.ge.s32.totalorder %s5650_s12, 1  ;;  %s5650_s12 = sphi %s5672_s12, %s13_s12  }
   0x2   : > { %p137_p1 = scmp.lt.s32.totalorder %s5650_s12, 3 }
   0x4   : > { %p138_p2 = pnand %p4159_p0, %p137_p1 }
   0x5   : > { %v4163_v0 = vld [vmem:[%s6770_s1 + $0x4] sm:$0xf] (!%p138_p2)  ;;  %vm355_vm0 = vcmask (!%p138_p2), 1043456   ;;  %v5686_v1 = vld [vmem:[%s6770_s1 + $0x10] sm:$0xf] (!%p138_p2)  ;;  %p161_p3 = scmp.lt.s32.totalorder (!%p138_p2), %s4155_s13, 1 }
   0x6   : > { %141 = sbr.rel (%p138_p2) target bundleno = 559 (0x22f), region = 32  ;;  %4841 = vmatprep.subr.msk.mxu1 (!%p138_p2), %vm355_vm0, %v4163_v0  ;;  %5065 = vmatprep.subr.msk.mxu0 (!%p138_p2), %vm355_vm0, %v5686_v1  ;;  %v207_v2 = vld [vmem:[%s6770_s1] sm:$0xf] (!%p138_p2)  ;;  %v4352_v3 = vld [vmem:[%s6770_s1 + $0x14] sm:$0xf] (!%p138_p2)  ;;  %vm246_vm1 = vcmask (!%p138_p2), 31744  }
   0x7   : > { %4842 = vmatpush3.msk.msra.mxu1 (!%p138_p2), %vm355_vm0, %v4163_v0  ;;  %5066 = vmatpush3.msk.msra.mxu0 (!%p138_p2), %vm355_vm0, %v5686_v1  ;;  %v5723_v10 = vld [vmem:[%s6770_s1 + $0x18] sm:$0xf] (!%p138_p2)  ;;  %v5728_v11 = vld [vmem:[%s6770_s1 + $0x8] sm:$0xf] (!%p138_p2)  ;;  %v5811_v48 = vld [vmem:[%s6770_s1 + $0x1c] sm:$0xf] (!%p138_p2) }
   0x8   : > { %4897 = vmatprep.subr.msk.mxu1 (!%p138_p2), %vm355_vm0, %v207_v2  ;;  %5121 = vmatprep.subr.msk.mxu0 (!%p138_p2), %vm355_vm0, %v4352_v3  ;;  %vm4049_vm2 = vcmask (!%p138_p2), 64512   ;;  %vm4052_vm3 = vcmask (!%p138_p2), 64514   ;;  %vm4055_vm4 = vcmask (!%p138_p2), 58368   ;;  %vm4057_vm5 = vcmask (!%p138_p2), 64516  }
   0x9   : > { %vm4060_vm6 = vcmask (!%p138_p2), 60416   ;;  %vm4062_vm7 = vcmask (!%p138_p2), 64518   ;;  %vm4065_vm8 = vcmask (!%p138_p2), 62464  }
   0xd   : > { %s6774_s13 = smov (!%p161_p3, %s4155_s13), 1 }
   0xe   : > { %s5635_s22 = smul.u32 328, %s6774_s13  ;;  %s4507_s11 = sshll.u32 %s6774_s13, 8 }
   0xf   : > { %s6633_s16 = scalar_lea.vmem %s6772_s3, %s4507_s11 }
  0x10   : > { %s5708_s25 = scalar_lea.vmem %s6769_s0, %s5635_s22 }
  0x11   : > { %v208_v4 = vld [vmem:[%s5708_s25 + $0x1] sm:$0xff]  ;;  %v1820_v5 = vld [vmem:[%s5708_s25 + $0x13] sm:$0xff]  ;;  %v209_v6 = vld [vmem:[%s5708_s25 + $0x9] sm:$0xff] }
  0x12   : > { %4843 = vmatprep.mubr.msk.f32.mxu1 %vm246_vm1, %v208_v4  ;;  %5067 = vmatprep.mubr.msk.f32.mxu0 %vm246_vm1, %v1820_v5  ;;  %v1821_v7 = vld [vmem:[%s5708_s25 + $0x1b] sm:$0xff]  ;;  %v210_v8 = vld [vmem:[%s5708_s25 + $0x11] sm:$0xff]  ;;  %v1822_v9 = vld [vmem:[%s5708_s25 + $0x23] sm:$0xff] }
  0x13   : > { %4844 = vmatmul.mubr.msk.f32.vlgmr.msra.gmra.mrb[0].mxu1 %vm246_vm1, %v209_v6  ;;  %5068 = vmatmul.mubr.msk.f32.vlgmr.msra.gmra.mrb[0].mxu0 %vm246_vm1, %v1821_v7  ;;  %v211_v12 = vld [vmem:[%s5708_s25 + $0x19] sm:$0xff]  ;;  %v1823_v13 = vld [vmem:[%s5708_s25 + $0x2b] sm:$0xff]  ;;  %v212_v14 = vld [vmem:[%s5708_s25 + $0x21] sm:$0xff] }
  0x14   : > { %4898 = vmatpush3.msk.msra.mxu1 %vm355_vm0, %v207_v2  ;;  %5122 = vmatpush3.msk.msra.mxu0 %vm355_vm0, %v4352_v3  ;;  %v1824_v15 = vld [vmem:[%s5708_s25 + $0x33] sm:$0xff]  ;;  %v213_v16 = vld [vmem:[%s5708_s25 + $0x29] sm:$0xff]  ;;  %v1825_v17 = vld [vmem:[%s5708_s25 + $0x3b] sm:$0xff] }
  0x15   : > { %4846 = vmatprep.mubr.msk.f32.mxu1 %vm246_vm1, %v210_v8  ;;  %5070 = vmatprep.mubr.msk.f32.mxu0 %vm246_vm1, %v1822_v9  ;;  %v214_v18 = vld [vmem:[%s5708_s25 + $0x31] sm:$0xff]  ;;  %v1826_v19 = vld [vmem:[%s5708_s25 + $0x43] sm:$0xff]  ;;  %v215_v20 = vld [vmem:[%s5708_s25 + $0x39] sm:$0xff] }
  0x16   : > { %5177 = vmatprep.subr.msk.mxu0 %vm355_vm0, %v5723_v10  ;;  %4953 = vmatprep.subr.msk.mxu1 %vm355_vm0, %v5728_v11  ;;  %v1827_v21 = vld [vmem:[%s5708_s25 + $0x4b] sm:$0xff]  ;;  %v216_v22 = vld [vmem:[%s5708_s25 + $0x41] sm:$0xff]  ;;  %v1828_v23 = vld [vmem:[%s5708_s25 + $0x53] sm:$0xff] }
  0x17   : > { %4847 = vmatmul.mubr.msk.f32.gmra.mrb[2].mxu1 %vm246_vm1, %v211_v12  ;;  %5071 = vmatmul.mubr.msk.f32.gmra.mrb[2].mxu0 %vm246_vm1, %v1823_v13  ;;  %v217_v24 = vld [vmem:[%s5708_s25 + $0x49] sm:$0xff]  ;;  %v1829_v25 = vld [vmem:[%s5708_s25 + $0x5b] sm:$0xff]  ;;  %v218_v26 = vld [vmem:[%s5708_s25 + $0x51] sm:$0xff] }
  0x18   : > { %4849 = vmatprep.mubr.msk.f32.mxu1 %vm246_vm1, %v212_v14  ;;  %5073 = vmatprep.mubr.msk.f32.mxu0 %vm246_vm1, %v1824_v15  ;;  %v1830_v27 = vld [vmem:[%s5708_s25 + $0x63] sm:$0xff]  ;;  %v219_v28 = vld [vmem:[%s5708_s25 + $0x59] sm:$0xff]  ;;  %v1831_v29 = vld [vmem:[%s5708_s25 + $0x6b] sm:$0xff] }
  0x19   : > { %v220_v30 = vld [vmem:[%s5708_s25 + $0x61] sm:$0xff]  ;;  %v1832_v31 = vld [vmem:[%s5708_s25 + $0x73] sm:$0xff]  ;;  %v221_v32 = vld [vmem:[%s5708_s25 + $0x69] sm:$0xff] }
  0x1a   : > { %v1833_v33 = vld [vmem:[%s5708_s25 + $0x7b] sm:$0xff]  ;;  %v222_v34 = vld [vmem:[%s5708_s25 + $0x71] sm:$0xff]  ;;  %v1834_v35 = vld [vmem:[%s5708_s25 + $0x83] sm:$0xff] }
  0x1b   : > { %4850 = vmatmul.mubr.msk.f32.gmra.mrb[4].mxu1 %vm246_vm1, %v213_v16  ;;  %5074 = vmatmul.mubr.msk.f32.gmra.mrb[4].mxu0 %vm246_vm1, %v1825_v17  ;;  %v223_v36 = vld [vmem:[%s5708_s25 + $0x79] sm:$0xff]  ;;  %v1835_v37 = vld [vmem:[%s5708_s25 + $0x8b] sm:$0xff]  ;;  %v224_v38 = vld [vmem:[%s5708_s25 + $0x81] sm:$0xff] }
  0x1c   : > { %4852 = vmatprep.mubr.msk.f32.mxu1 %vm246_vm1, %v214_v18  ;;  %5076 = vmatprep.mubr.msk.f32.mxu0 %vm246_vm1, %v1826_v19  ;;  %v1836_v39 = vld [vmem:[%s5708_s25 + $0x93] sm:$0xff]  ;;  %v225_v40 = vld [vmem:[%s5708_s25 + $0x89] sm:$0xff]  ;;  %v1837_v41 = vld [vmem:[%s5708_s25 + $0x9b] sm:$0xff] }
  0x1d   : > { %v226_v42 = vld [vmem:[%s5708_s25 + $0x91] sm:$0xff]  ;;  %v227_v44 = vld [vmem:[%s5708_s25 + $0x99] sm:$0xff]  ;;  %v228_v46 = vld [vmem:[%s5708_s25 + $0xa1] sm:$0xff] }
  0x1e   : > { %v2250_v43 = vld [vmem:[%s5708_s25 + $0x14] sm:$0xff]  ;;  %v2251_v45 = vld [vmem:[%s5708_s25 + $0x1c] sm:$0xff]  ;;  %v5806_v47 = vld [vmem:[%s5708_s25 + $0x24] sm:$0xff] }
  0x1f   : > { %4853 = vmatmul.mubr.msk.f32.gmra.mrb[6].mxu1 %vm246_vm1, %v215_v20  ;;  %5077 = vmatmul.mubr.msk.f32.gmra.mrb[6].mxu0 %vm246_vm1, %v1827_v21  ;;  %v229_v49 = vld [vmem:[%s5708_s25 + $0xa9] sm:$0xff]  ;;  %v230_v51 = vld [vmem:[%s5708_s25 + $0xb1] sm:$0xff]  ;;  %v231_v53 = vld [vmem:[%s5708_s25 + $0xb9] sm:$0xff] }
  0x20   : > { %4855 = vmatprep.mubr.msk.f32.mxu1 %vm246_vm1, %v216_v22  ;;  %5079 = vmatprep.mubr.msk.f32.mxu0 %vm246_vm1, %v1828_v23  ;;  %v5820_v50 = vld [vmem:[%s5708_s25 + $0x2c] sm:$0xff]  ;;  %v5826_v52 = vld [vmem:[%s5708_s25 + $0x34] sm:$0xff]  ;;  %v5838_v54 = vld [vmem:[%s5708_s25 + $0x3c] sm:$0xff] }
  0x21   : > { %v232_v55 = vld [vmem:[%s5708_s25 + $0xc1] sm:$0xff]  ;;  %v233_v57 = vld [vmem:[%s5708_s25 + $0xc9] sm:$0xff]  ;;  %v234_v59 = vld [vmem:[%s5708_s25 + $0xd1] sm:$0xff] }
  0x22   : > { %v5842_v56 = vld [vmem:[%s5708_s25 + $0x44] sm:$0xff]  ;;  %v5852_v58 = vld [vmem:[%s5708_s25 + $0x4c] sm:$0xff]  ;;  %v5856_v60 = vld [vmem:[%s5708_s25 + $0x54] sm:$0xff] }
  0x23   : > { %4856 = vmatmul.mubr.msk.f32.gmra.mrb[8].mxu1 %vm246_vm1, %v217_v24  ;;  %5080 = vmatmul.mubr.msk.f32.gmra.mrb[8].mxu0 %vm246_vm1, %v1829_v25  ;;  %v235_v61 = vld [vmem:[%s5708_s25 + $0xd9] sm:$0xff]  ;;  %v236_v63 = vld [vmem:[%s5708_s25 + $0xe1] sm:$0xff]  ;;  %v237_v2 = vld [vmem:[%s5708_s25 + $0xe9] sm:$0xff] }
  0x24   : > { %4858 = vmatprep.mubr.msk.f32.mxu1 %vm246_vm1, %v218_v26  ;;  %5082 = vmatprep.mubr.msk.f32.mxu0 %vm246_vm1, %v1830_v27  ;;  %v5866_v62 = vld [vmem:[%s5708_s25 + $0x5c] sm:$0xff]  ;;  %v5870_v0 = vld [vmem:[%s5708_s25 + $0x64] sm:$0xff]  ;;  %v5880_v3 = vld [vmem:[%s5708_s25 + $0x6c] sm:$0xff] }
  0x25   : > { %v238_v4 = vld [vmem:[%s5708_s25 + $0xf1] sm:$0xff]  ;;  %v239_v6 = vld [vmem:[%s5708_s25 + $0xf9] sm:$0xff]  ;;  %v240_v8 = vld [vmem:[%s5708_s25 + $0x101] sm:$0xff] }
  0x26   : > { %v5884_v5 = vld [vmem:[%s5708_s25 + $0x74] sm:$0xff]  ;;  %v5894_v7 = vld [vmem:[%s5708_s25 + $0x7c] sm:$0xff]  ;;  %v5898_v9 = vld [vmem:[%s5708_s25 + $0x84] sm:$0xff] }
  0x27   : > { %4859 = vmatmul.mubr.msk.f32.gmra.mrb[10].mxu1 %vm246_vm1, %v219_v28  ;;  %5083 = vmatmul.mubr.msk.f32.gmra.mrb[10].mxu0 %vm246_vm1, %v1831_v29  ;;  %v5908_v12 = vld [vmem:[%s5708_s25 + $0x8c] sm:$0xff]  ;;  %v5912_v14 = vld [vmem:[%s5708_s25 + $0x94] sm:$0xff]  ;;  %v5922_v16 = vld [vmem:[%s5708_s25 + $0x9c] sm:$0xff] }
  0x28   : > { %4861 = vmatprep.mubr.msk.f32.mxu1 %vm246_vm1, %v220_v30  ;;  %5085 = vmatprep.mubr.msk.f32.mxu0 %vm246_vm1, %v1832_v31  ;;  %v242_v13 = vld [vmem:[%s5708_s25 + $0x111] sm:$0xff]  ;;  %v243_v15 = vld [vmem:[%s5708_s25 + $0x119] sm:$0x3f]  ;;  %v171_v17 = vld [vmem:[%s5708_s25] sm:$0xff] }
  0x29   : > { %v5926_v18 = vld [vmem:[%s5708_s25 + $0xa4] sm:$0xff]  ;;  %v5936_v20 = vld [vmem:[%s5708_s25 + $0xac] sm:$0xff]  ;;  %v5940_v22 = vld [vmem:[%s5708_s25 + $0xb4] sm:$0xff] }
  0x2a   : > { %v172_v19 = vld [vmem:[%s5708_s25 + $0x8] sm:$0xff]  ;;  %v173_v21 = vld [vmem:[%s5708_s25 + $0x10] sm:$0xff]  ;;  %v174_v24 = vld [vmem:[%s5708_s25 + $0x18] sm:$0xff] }
  0x2b   : > { %4862 = vmatmul.mubr.msk.f32.gmra.mrb[12].mxu1 %vm246_vm1, %v221_v32  ;;  %5086 = vmatmul.mubr.msk.f32.gmra.mrb[12].mxu0 %vm246_vm1, %v1833_v33  ;;  %v5945_v23 = vld [vmem:[%s6770_s1 + $0xc] sm:$0xf]  ;;  %v5955_v25 = vld [vmem:[%s5708_s25 + $0xbc] sm:$0xff]  ;;  %v5961_v27 = vld [vmem:[%s5708_s25 + $0xc4] sm:$0xff] }
  0x2c   : > { %4864 = vmatprep.mubr.msk.f32.mxu1 %vm246_vm1, %v222_v34  ;;  %5088 = vmatprep.mubr.msk.f32.mxu0 %vm246_vm1, %v1834_v35  ;;  %v175_v26 = vld [vmem:[%s5708_s25 + $0x20] sm:$0xff]  ;;  %v5973_v28 = vld [vmem:[%s5708_s25 + $0xcc] sm:$0xff]  ;;  %v5977_v30 = vld [vmem:[%s5708_s25 + $0xd4] sm:$0xff] }
  0x2d   : > { %v177_v29 = vld [vmem:[%s5708_s25 + $0x30] sm:$0xff]  ;;  %v178_v31 = vld [vmem:[%s5708_s25 + $0x38] sm:$0xff]  ;;  %v179_v33 = vld [vmem:[%s5708_s25 + $0x40] sm:$0xff] }
  0x2e   : > { %v5987_v32 = vld [vmem:[%s5708_s25 + $0xdc] sm:$0xff]  ;;  %v5991_v34 = vld [vmem:[%s5708_s25 + $0xe4] sm:$0xff] }
  0x2f   : > { %4865 = vmatmul.mubr.msk.f32.gmra.mrb[14].mxu1 %vm246_vm1, %v223_v36  ;;  %5089 = vmatmul.mubr.msk.f32.gmra.mrb[14].mxu0 %vm246_vm1, %v1835_v37  ;;  %v180_v35 = vld [vmem:[%s5708_s25 + $0x48] sm:$0xff]  ;;  %v181_v37 = vld [vmem:[%s5708_s25 + $0x50] sm:$0xff] }
  0x30   : > { %4867 = vmatprep.mubr.msk.f32.mxu1 %vm246_vm1, %v224_v38  ;;  %5091 = vmatprep.mubr.msk.f32.mxu0 %vm246_vm1, %v1836_v39  ;;  %v6001_v36 = vld [vmem:[%s5708_s25 + $0xec] sm:$0xff]  ;;  %v6005_v38 = vld [vmem:[%s5708_s25 + $0xf4] sm:$0xff] }
  0x31   : > { %v182_v39 = vld [vmem:[%s5708_s25 + $0x58] sm:$0xff] }
  0x33   : > { %4868 = vmatmul.mubr.msk.f32.gmra.mrb[16].mxu1 %vm246_vm1, %v225_v40  ;;  %5092 = vmatmul.mubr.msk.f32.gmra.mrb[16].mxu0 %vm246_vm1, %v1837_v41  ;;  %v6015_v40 = vld [vmem:[%s5708_s25 + $0xfc] sm:$0xff] }
  0x34   : > { %4870 = vmatprep.mubr.msk.f32.mxu1 %vm246_vm1, %v226_v42  ;;  %5123 = vmatprep.mubr.msk.f32.mxu0 %vm246_vm1, %v2250_v43  ;;  %v183_v41 = vld [vmem:[%s5708_s25 + $0x60] sm:$0xff]  ;;  %v184_v43 = vld [vmem:[%s5708_s25 + $0x68] sm:$0xff] }
  0x35   : > { %v6019_v42 = vld [vmem:[%s5708_s25 + $0x104] sm:$0xff] }
  0x37   : > { %4871 = vmatmul.mubr.msk.f32.gmra.mrb[18].mxu1 %vm246_vm1, %v227_v44  ;;  %5124 = vmatmul.mubr.msk.f32.vlgmr.msra.gmra.mrb[0].mxu0 %vm246_vm1, %v2251_v45  ;;  %v6029_v44 = vld [vmem:[%s5708_s25 + $0x10c] sm:$0xff] }
  0x38   : > { %5178 = vmatpush3.msk.msra.mxu0 %vm355_vm0, %v5723_v10  ;;  %4873 = vmatprep.mubr.msk.f32.mxu1 %vm246_vm1, %v228_v46  ;;  %v241_v10 = vld [vmem:[%s5708_s25 + $0x109] sm:$0xff]  ;;  %v6033_v46 = vld [vmem:[%s5708_s25 + $0x114] sm:$0xff] }
  0x39   : > { %5126 = vmatprep.mubr.msk.f32.mxu0 %vm246_vm1, %v5806_v47  ;;  %5233 = vmatprep.subr.msk.mxu0 %vm355_vm0, %v5811_v48  ;;  %v185_v45 = vld [vmem:[%s5708_s25 + $0x70] sm:$0xff] }
  0x3b   : > { %4874 = vmatmul.mubr.msk.f32.gmra.mrb[20].mxu1 %vm246_vm1, %v229_v49  ;;  %5127 = vmatmul.mubr.msk.f32.gmra.mrb[2].mxu0 %vm246_vm1, %v5820_v50  ;;  %v186_v49 = vld [vmem:[%s5708_s25 + $0x78] sm:$0xff] }
  0x3c   : > { %4876 = vmatprep.mubr.msk.f32.mxu1 %vm246_vm1, %v230_v51  ;;  %5129 = vmatprep.mubr.msk.f32.mxu0 %vm246_vm1, %v5826_v52  ;;  %v6043_v51 = vld [vmem:[%s5708_s25 + $0x11c] sm:$0xff] }
  0x3f   : > { %4877 = vmatmul.mubr.msk.f32.gmra.mrb[22].mxu1 %vm246_vm1, %v231_v53  ;;  %5130 = vmatmul.mubr.msk.f32.gmra.mrb[4].mxu0 %vm246_vm1, %v5838_v54  ;;  %v187_v53 = vld [vmem:[%s5708_s25 + $0x80] sm:$0xff] }
  0x40   : > { %4879 = vmatprep.mubr.msk.f32.mxu1 %vm246_vm1, %v232_v55  ;;  %5132 = vmatprep.mubr.msk.f32.mxu0 %vm246_vm1, %v5842_v56  ;;  %v6047_v55 = vld [vmem:[%s5708_s25 + $0x124] sm:$0xff] }
  0x43   : > { %4880 = vmatmul.mubr.msk.f32.gmra.mrb[24].mxu1 %vm246_vm1, %v233_v57  ;;  %5133 = vmatmul.mubr.msk.f32.gmra.mrb[6].mxu0 %vm246_vm1, %v5852_v58  ;;  %v188_v57 = vld [vmem:[%s5708_s25 + $0x88] sm:$0xff] }
  0x44   : > { %4882 = vmatprep.mubr.msk.f32.mxu1 %vm246_vm1, %v234_v59  ;;  %5135 = vmatprep.mubr.msk.f32.mxu0 %vm246_vm1, %v5856_v60  ;;  %v2285_v59 = vld [vmem:[%s5708_s25 + $0x12c] sm:$0x3f] }
  0x47   : > { %4883 = vmatmul.mubr.msk.f32.gmra.mrb[26].mxu1 %vm246_vm1, %v235_v61  ;;  %5136 = vmatmul.mubr.msk.f32.gmra.mrb[8].mxu0 %vm246_vm1, %v5866_v62  ;;  %v189_v61 = vld [vmem:[%s5708_s25 + $0x90] sm:$0xff] }
  0x48   : > { %4885 = vmatprep.mubr.msk.f32.mxu1 %vm246_vm1, %v236_v63  ;;  %5138 = vmatprep.mubr.msk.f32.mxu0 %vm246_vm1, %v5870_v0  ;;  %v190_v63 = vld [vmem:[%s5708_s25 + $0x98] sm:$0xff] }
  0x4b   : > { %4886 = vmatmul.mubr.msk.f32.gmra.mrb[28].mxu1 %vm246_vm1, %v237_v2  ;;  %5139 = vmatmul.mubr.msk.f32.gmra.mrb[10].mxu0 %vm246_vm1, %v5880_v3  ;;  %v191_v2 = vld [vmem:[%s5708_s25 + $0xa0] sm:$0xff] }
  0x4c   : > { %4888 = vmatprep.mubr.msk.f32.mxu1 %vm246_vm1, %v238_v4  ;;  %5141 = vmatprep.mubr.msk.f32.mxu0 %vm246_vm1, %v5884_v5  ;;  %v6068_v4 = vld [vmem:[%s6770_s1 + $0x20] sm:$0xf] }
  0x4f   : > { %4889 = vmatmul.mubr.msk.f32.gmra.mrb[30].mxu1 %vm246_vm1, %v239_v6  ;;  %5142 = vmatmul.mubr.msk.f32.gmra.mrb[12].mxu0 %vm246_vm1, %v5894_v7  ;;  %v193_v6 = vld [vmem:[%s5708_s25 + $0xb0] sm:$0xff] }
  0x50   : > { %4891 = vmatprep.mubr.msk.f32.mxu1 %vm246_vm1, %v240_v8  ;;  %5144 = vmatprep.mubr.msk.f32.mxu0 %vm246_vm1, %v5898_v9  ;;  %v206_v8 = vld [vmem:[%s5708_s25 + $0x118] sm:$0x3f] }
  0x53   : > { %4892 = vmatmul.mubr.msk.f32.gmra.mrb[32].mxu1 %vm246_vm1, %v241_v10  ;;  %5145 = vmatmul.mubr.msk.f32.gmra.mrb[14].mxu0 %vm246_vm1, %v5908_v12  ;;  %v961_v10 = vld [vmem:[%s5708_s25 + $0xa] sm:$0xff] }
  0x54   : > { %4894 = vmatprep.mubr.msk.f32.mxu1 %vm246_vm1, %v242_v13  ;;  %5147 = vmatprep.mubr.msk.f32.mxu0 %vm246_vm1, %v5912_v14  ;;  %v6156_v13 = vld [vmem:[%s5708_s25 + $0x1a] sm:$0xff] }
  0x57   : > { %4895 = vmatmul.mubr.msk.f32.gmra.mrb[34].mxu1 %vm246_vm1, %v243_v15  ;;  %5148 = vmatmul.mubr.msk.f32.gmra.mrb[16].mxu0 %vm246_vm1, %v5922_v16  ;;  %v6174_v15 = vld [vmem:[%s5708_s25 + $0x2a] sm:$0xff] }
  0x58   : > { %4899 = vmatprep.mubr.msk.f32.mxu1 %vm246_vm1, %v171_v17  ;;  %5150 = vmatprep.mubr.msk.f32.mxu0 %vm246_vm1, %v5926_v18  ;;  %v6188_v17 = vld [vmem:[%s5708_s25 + $0x3a] sm:$0xff] }
  0x5b   : > { %4900 = vmatmul.mubr.msk.f32.vlgmr.msra.gmra.mrb[0].mxu1 %vm246_vm1, %v172_v19  ;;  %5151 = vmatmul.mubr.msk.f32.gmra.mrb[18].mxu0 %vm246_vm1, %v5936_v20  ;;  %v6202_v19 = vld [vmem:[%s5708_s25 + $0x4a] sm:$0xff] }
  0x5c   : > { %4954 = vmatpush3.msk.msra.mxu1 %vm355_vm0, %v5728_v11  ;;  %4902 = vmatprep.mubr.msk.f32.mxu1 %vm246_vm1, %v173_v21  ;;  %v176_v11 = vld [vmem:[%s5708_s25 + $0x28] sm:$0xff]  ;;  %v6216_v21 = vld [vmem:[%s5708_s25 + $0x5a] sm:$0xff] }
  0x5d   : > { %5153 = vmatprep.mubr.msk.f32.mxu0 %vm246_vm1, %v5940_v22  ;;  %5009 = vmatprep.subr.msk.mxu1 %vm355_vm0, %v5945_v23 }
  0x5f   : > { %4903 = vmatmul.mubr.msk.f32.gmra.mrb[2].mxu1 %vm246_vm1, %v174_v24  ;;  %5154 = vmatmul.mubr.msk.f32.gmra.mrb[20].mxu0 %vm246_vm1, %v5955_v25  ;;  %v6233_v24 = vld [vmem:[%s5708_s25 + $0x72] sm:$0xff] }
  0x60   : > { %4905 = vmatprep.mubr.msk.f32.mxu1 %vm246_vm1, %v175_v26  ;;  %5156 = vmatprep.mubr.msk.f32.mxu0 %vm246_vm1, %v5961_v27  ;;  %v2713_v26 = vld [vmem:[%s5708_s25 + $0x12c] sm:$0xff] }
  0x63   : > { %4906 = vmatmul.mubr.msk.f32.gmra.mrb[4].mxu1 %vm246_vm1, %v176_v11  ;;  %5157 = vmatmul.mubr.msk.f32.gmra.mrb[22].mxu0 %vm246_vm1, %v5973_v28  ;;  %v2714_v11 = vld [vmem:[%s5708_s25 + $0x134] sm:$0xff] }
  0x64   : > { %4908 = vmatprep.mubr.msk.f32.mxu1 %vm246_vm1, %v177_v29  ;;  %5159 = vmatprep.mubr.msk.f32.mxu0 %vm246_vm1, %v5977_v30  ;;  %v2715_v29 = vld [vmem:[%s5708_s25 + $0x13c] sm:$0x3f] }
  0x67   : > { %4909 = vmatmul.mubr.msk.f32.gmra.mrb[6].mxu1 %vm246_vm1, %v178_v31  ;;  %5160 = vmatmul.mubr.msk.f32.gmra.mrb[24].mxu0 %vm246_vm1, %v5987_v32  ;;  %v3110_v31 = vld [vmem:[%s5708_s25 + $0x25] sm:$0xff] }
  0x68   : > { %4911 = vmatprep.mubr.msk.f32.mxu1 %vm246_vm1, %v179_v33  ;;  %5162 = vmatprep.mubr.msk.f32.mxu0 %vm246_vm1, %v5991_v34  ;;  %v3111_v33 = vld [vmem:[%s5708_s25 + $0x2d] sm:$0xff] }
  0x6b   : > { %4912 = vmatmul.mubr.msk.f32.gmra.mrb[8].mxu1 %vm246_vm1, %v180_v35  ;;  %5163 = vmatmul.mubr.msk.f32.gmra.mrb[26].mxu0 %vm246_vm1, %v6001_v36  ;;  %v3112_v35 = vld [vmem:[%s5708_s25 + $0x35] sm:$0xff] }
  0x6c   : > { %4914 = vmatprep.mubr.msk.f32.mxu1 %vm246_vm1, %v181_v37  ;;  %5165 = vmatprep.mubr.msk.f32.mxu0 %vm246_vm1, %v6005_v38  ;;  %v3113_v37 = vld [vmem:[%s5708_s25 + $0x3d] sm:$0xff] }
  0x6f   : > { %4915 = vmatmul.mubr.msk.f32.gmra.mrb[10].mxu1 %vm246_vm1, %v182_v39  ;;  %5166 = vmatmul.mubr.msk.f32.gmra.mrb[28].mxu0 %vm246_vm1, %v6015_v40  ;;  %v3114_v39 = vld [vmem:[%s5708_s25 + $0x45] sm:$0xff] }
  0x70   : > { %4917 = vmatprep.mubr.msk.f32.mxu1 %vm246_vm1, %v183_v41  ;;  %5168 = vmatprep.mubr.msk.f32.mxu0 %vm246_vm1, %v6019_v42  ;;  %v3115_v41 = vld [vmem:[%s5708_s25 + $0x4d] sm:$0xff] }
  0x73   : > { %4918 = vmatmul.mubr.msk.f32.gmra.mrb[12].mxu1 %vm246_vm1, %v184_v43  ;;  %5169 = vmatmul.mubr.msk.f32.gmra.mrb[30].mxu0 %vm246_vm1, %v6029_v44  ;;  %v3116_v43 = vld [vmem:[%s5708_s25 + $0x55] sm:$0xff] }
  0x74   : > { %4920 = vmatprep.mubr.msk.f32.mxu1 %vm246_vm1, %v185_v45  ;;  %5171 = vmatprep.mubr.msk.f32.mxu0 %vm246_vm1, %v6033_v46  ;;  %v3117_v45 = vld [vmem:[%s5708_s25 + $0x5d] sm:$0xff] }
  0x77   : > { %4921 = vmatmul.mubr.msk.f32.gmra.mrb[14].mxu1 %vm246_vm1, %v186_v49  ;;  %5172 = vmatmul.mubr.msk.f32.gmra.mrb[32].mxu0 %vm246_vm1, %v6043_v51  ;;  %v3118_v49 = vld [vmem:[%s5708_s25 + $0x65] sm:$0xff] }
  0x78   : > { %4923 = vmatprep.mubr.msk.f32.mxu1 %vm246_vm1, %v187_v53  ;;  %5174 = vmatprep.mubr.msk.f32.mxu0 %vm246_vm1, %v6047_v55  ;;  %v3119_v53 = vld [vmem:[%s5708_s25 + $0x6d] sm:$0xff] }
  0x7b   : > { %4924 = vmatmul.mubr.msk.f32.gmra.mrb[16].mxu1 %vm246_vm1, %v188_v57  ;;  %5175 = vmatmul.mubr.msk.f32.gmra.mrb[34].mxu0 %vm246_vm1, %v2285_v59  ;;  %v3120_v57 = vld [vmem:[%s5708_s25 + $0x75] sm:$0xff]  ;;  %v6344_v59 = vld [vmem:[%s5708_s25 + $0xea] sm:$0xff] }
  0x7c   : > { %4926 = vmatprep.mubr.msk.f32.mxu1 %vm246_vm1, %v189_v61  ;;  %5179 = vmatprep.mubr.msk.f32.mxu0 %vm246_vm1, %v5806_v47  ;;  %v192_v47 = vld [vmem:[%s5708_s25 + $0xa8] sm:$0xff]  ;;  %v3121_v61 = vld [vmem:[%s5708_s25 + $0x7d] sm:$0xff] }
  0x7f   : > { %4927 = vmatmul.mubr.msk.f32.gmra.mrb[18].mxu1 %vm246_vm1, %v190_v63  ;;  %5180 = vmatmul.mubr.msk.f32.vlgmr.msra.gmra.mrb[0].mxu0 %vm246_vm1, %v5820_v50  ;;  %v195_v50 = vld [vmem:[%s5708_s25 + $0xc0] sm:$0xff]  ;;  %v6348_v63 = vld [vmem:[%s5708_s25 + $0xf2] sm:$0xff] }
  0x80   : > { %5234 = vmatpush3.msk.msra.mxu0 %vm355_vm0, %v5811_v48  ;;  %4929 = vmatprep.mubr.msk.f32.mxu1 %vm246_vm1, %v191_v2  ;;  %v194_v48 = vld [vmem:[%s5708_s25 + $0xb8] sm:$0xff]  ;;  %v3122_v2 = vld [vmem:[%s5708_s25 + $0x85] sm:$0xff] }
  0x81   : > { %5182 = vmatprep.mubr.msk.f32.mxu0 %vm246_vm1, %v5826_v52  ;;  %5289 = vmatprep.subr.msk.mxu0 %vm355_vm0, %v6068_v4  ;;  %v196_v52 = vld [vmem:[%s5708_s25 + $0xc8] sm:$0xff] }
  0x83   : > { %4930 = vmatmul.mubr.msk.f32.gmra.mrb[20].mxu1 %vm246_vm1, %v192_v47  ;;  %5183 = vmatmul.mubr.msk.f32.gmra.mrb[2].mxu0 %vm246_vm1, %v5838_v54  ;;  %v197_v54 = vld [vmem:[%s5708_s25 + $0xd0] sm:$0xff] }
  0x84   : > { %4932 = vmatprep.mubr.msk.f32.mxu1 %vm246_vm1, %v193_v6  ;;  %5185 = vmatprep.mubr.msk.f32.mxu0 %vm246_vm1, %v5842_v56  ;;  %v198_v56 = vld [vmem:[%s5708_s25 + $0xd8] sm:$0xff]  ;;  %v3123_v47 = vld [vmem:[%s5708_s25 + $0x8d] sm:$0xff]  ;;  %v6362_v6 = vld [vmem:[%s5708_s25 + $0x102] sm:$0xff] }
  0x87   : > { %4933 = vmatmul.mubr.msk.f32.gmra.mrb[22].mxu1 %vm246_vm1, %v194_v48  ;;  %5186 = vmatmul.mubr.msk.f32.gmra.mrb[4].mxu0 %vm246_vm1, %v5852_v58  ;;  %v199_v58 = vld [vmem:[%s5708_s25 + $0xe0] sm:$0xff]  ;;  %v3124_v48 = vld [vmem:[%s5708_s25 + $0x95] sm:$0xff] }
  0x88   : > { %4935 = vmatprep.mubr.msk.f32.mxu1 %vm246_vm1, %v195_v50  ;;  %5188 = vmatprep.mubr.msk.f32.mxu0 %vm246_vm1, %v5856_v60  ;;  %v200_v60 = vld [vmem:[%s5708_s25 + $0xe8] sm:$0xff] }
  0x89   : > { %v6372_v50 = vld [vmem:[%s5708_s25 + $0x10a] sm:$0xff] }
  0x8b   : > { %4936 = vmatmul.mubr.msk.f32.gmra.mrb[24].mxu1 %vm246_vm1, %v196_v52  ;;  %5189 = vmatmul.mubr.msk.f32.gmra.mrb[6].mxu0 %vm246_vm1, %v5866_v62  ;;  %v201_v62 = vld [vmem:[%s5708_s25 + $0xf0] sm:$0xff]  ;;  %v3125_v52 = vld [vmem:[%s5708_s25 + $0x9d] sm:$0xff] }
  0x8c   : > { %4938 = vmatprep.mubr.msk.f32.mxu1 %vm246_vm1, %v197_v54  ;;  %5191 = vmatprep.mubr.msk.f32.mxu0 %vm246_vm1, %v5870_v0  ;;  %v202_v0 = vld [vmem:[%s5708_s25 + $0xf8] sm:$0xff] }
  0x8d   : > { %v6376_v54 = vld [vmem:[%s5708_s25 + $0x112] sm:$0xff] }
  0x8f   : > { %4939 = vmatmul.mubr.msk.f32.gmra.mrb[26].mxu1 %vm246_vm1, %v198_v56  ;;  %5192 = vmatmul.mubr.msk.f32.gmra.mrb[8].mxu0 %vm246_vm1, %v5880_v3  ;;  %v203_v3 = vld [vmem:[%s5708_s25 + $0x100] sm:$0xff] }
  0x90   : > { %4941 = vmatprep.mubr.msk.f32.mxu1 %vm246_vm1, %v199_v58  ;;  %5194 = vmatprep.mubr.msk.f32.mxu0 %vm246_vm1, %v5884_v5  ;;  %v204_v5 = vld [vmem:[%s5708_s25 + $0x108] sm:$0xff]  ;;  %v995_v58 = vld [vmem:[%s5708_s25 + $0x11a] sm:$0x3f] }
  0x91   : > { %v3126_v56 = vld [vmem:[%s5708_s25 + $0xa5] sm:$0xff] }
  0x93   : > { %4942 = vmatmul.mubr.msk.f32.gmra.mrb[28].mxu1 %vm246_vm1, %v200_v60  ;;  %5195 = vmatmul.mubr.msk.f32.gmra.mrb[10].mxu0 %vm246_vm1, %v5894_v7  ;;  %v205_v7 = vld [vmem:[%s5708_s25 + $0x110] sm:$0xff] }
  0x94   : > { %4944 = vmatprep.mubr.msk.f32.mxu1 %vm246_vm1, %v201_v62  ;;  %5197 = vmatprep.mubr.msk.f32.mxu0 %vm246_vm1, %v5898_v9  ;;  %v960_v9 = vld [vmem:[%s5708_s25 + $0x2] sm:$0xff]  ;;  %v3127_v60 = vld [vmem:[%s5708_s25 + $0xad] sm:$0xff]  ;;  %v3128_v62 = vld [vmem:[%s5708_s25 + $0xb5] sm:$0xff] }
  0x97   : > { %4945 = vmatmul.mubr.msk.f32.gmra.mrb[30].mxu1 %vm246_vm1, %v202_v0  ;;  %5198 = vmatmul.mubr.msk.f32.gmra.mrb[12].mxu0 %vm246_vm1, %v5908_v12  ;;  %v6146_v12 = vld [vmem:[%s5708_s25 + $0x12] sm:$0xff]  ;;  %v3129_v0 = vld [vmem:[%s5708_s25 + $0xbd] sm:$0xff] }
  0x98   : > { %4947 = vmatprep.mubr.msk.f32.mxu1 %vm246_vm1, %v203_v3  ;;  %5200 = vmatprep.mubr.msk.f32.mxu0 %vm246_vm1, %v5912_v14  ;;  %v6161_v14 = vld [vmem:[%s5708_s25 + $0x22] sm:$0xff] }
  0x99   : > { %v3130_v3 = vld [vmem:[%s5708_s25 + $0xc5] sm:$0xff] }
  0x9b   : > { %4948 = vmatmul.mubr.msk.f32.gmra.mrb[32].mxu1 %vm246_vm1, %v204_v5  ;;  %5201 = vmatmul.mubr.msk.f32.gmra.mrb[14].mxu0 %vm246_vm1, %v5922_v16  ;;  %v6177_v16 = vld [vmem:[%s5708_s25 + $0x32] sm:$0xff] }
  0x9c   : > { %4950 = vmatprep.mubr.msk.f32.mxu1 %vm246_vm1, %v205_v7  ;;  %5203 = vmatprep.mubr.msk.f32.mxu0 %vm246_vm1, %v5926_v18  ;;  %v6191_v18 = vld [vmem:[%s5708_s25 + $0x42] sm:$0xff]  ;;  %v3131_v5 = vld [vmem:[%s5708_s25 + $0xcd] sm:$0xff]  ;;  %v3132_v7 = vld [vmem:[%s5708_s25 + $0xd5] sm:$0xff] }
  0x9f   : > { %4951 = vmatmul.mubr.msk.f32.gmra.mrb[34].mxu1 %vm246_vm1, %v206_v8  ;;  %5204 = vmatmul.mubr.msk.f32.gmra.mrb[16].mxu0 %vm246_vm1, %v5936_v20  ;;  %v6205_v20 = vld [vmem:[%s5708_s25 + $0x52] sm:$0xff]  ;;  %v3134_v8 = vld [vmem:[%s5708_s25 + $0xe5] sm:$0xff] }
  0xa0   : > { %4955 = vmatprep.mubr.msk.f32.mxu1 %vm246_vm1, %v960_v9  ;;  %5206 = vmatprep.mubr.msk.f32.mxu0 %vm246_vm1, %v5940_v22  ;;  %v6219_v22 = vld [vmem:[%s5708_s25 + $0x62] sm:$0xff]  ;;  %v3135_v9 = vld [vmem:[%s5708_s25 + $0xed] sm:$0xff] }
  0xa3   : > { %4956 = vmatmul.mubr.msk.f32.vlgmr.msra.gmra.mrb[0].mxu1 %vm246_vm1, %v961_v10  ;;  %5207 = vmatmul.mubr.msk.f32.gmra.mrb[18].mxu0 %vm246_vm1, %v5955_v25  ;;  %v6244_v25 = vld [vmem:[%s5708_s25 + $0x7a] sm:$0xff] }
  0xa4   : > { %5010 = vmatpush3.msk.msra.mxu1 %vm355_vm0, %v5945_v23  ;;  %4958 = vmatprep.mubr.msk.f32.mxu1 %vm246_vm1, %v6146_v12  ;;  %v6230_v23 = vld [vmem:[%s5708_s25 + $0x6a] sm:$0xff]  ;;  %v3136_v10 = vld [vmem:[%s5708_s25 + $0xf5] sm:$0xff] }
  0xa5   : > { %5209 = vmatprep.mubr.msk.f32.mxu0 %vm246_vm1, %v5961_v27  ;;  %5345 = vmatprep.subr.msk.mxu1 %vm355_vm0, %v5686_v1  ;;  %v6248_v27 = vld [vmem:[%s5708_s25 + $0x82] sm:$0xff] }
  0xa7   : > { %4959 = vmatmul.mubr.msk.f32.gmra.mrb[2].mxu1 %vm246_vm1, %v6156_v13  ;;  %5210 = vmatmul.mubr.msk.f32.gmra.mrb[20].mxu0 %vm246_vm1, %v5973_v28  ;;  %v6258_v28 = vld [vmem:[%s5708_s25 + $0x8a] sm:$0xff] }
  0xa8   : > { %4961 = vmatprep.mubr.msk.f32.mxu1 %vm246_vm1, %v6161_v14  ;;  %5212 = vmatprep.mubr.msk.f32.mxu0 %vm246_vm1, %v5977_v30  ;;  %v6262_v30 = vld [vmem:[%s5708_s25 + $0x92] sm:$0xff] }
  0xab   : > { %4962 = vmatmul.mubr.msk.f32.gmra.mrb[4].mxu1 %vm246_vm1, %v6174_v15  ;;  %5213 = vmatmul.mubr.msk.f32.gmra.mrb[22].mxu0 %vm246_vm1, %v5987_v32  ;;  %v6272_v32 = vld [vmem:[%s5708_s25 + $0x9a] sm:$0xff] }
  0xac   : > { %4964 = vmatprep.mubr.msk.f32.mxu1 %vm246_vm1, %v6177_v16  ;;  %5215 = vmatprep.mubr.msk.f32.mxu0 %vm246_vm1, %v5991_v34  ;;  %v6276_v34 = vld [vmem:[%s5708_s25 + $0xa2] sm:$0xff] }
  0xaf   : > { %4965 = vmatmul.mubr.msk.f32.gmra.mrb[6].mxu1 %vm246_vm1, %v6188_v17  ;;  %5216 = vmatmul.mubr.msk.f32.gmra.mrb[24].mxu0 %vm246_vm1, %v6001_v36  ;;  %v6287_v36 = vld [vmem:[%s5708_s25 + $0xaa] sm:$0xff] }
  0xb0   : > { %4967 = vmatprep.mubr.msk.f32.mxu1 %vm246_vm1, %v6191_v18  ;;  %5218 = vmatprep.mubr.msk.f32.mxu0 %vm246_vm1, %v6005_v38  ;;  %v6292_v38 = vld [vmem:[%s5708_s25 + $0xb2] sm:$0xff] }
  0xb3   : > { %4968 = vmatmul.mubr.msk.f32.gmra.mrb[8].mxu1 %vm246_vm1, %v6202_v19  ;;  %5219 = vmatmul.mubr.msk.f32.gmra.mrb[26].mxu0 %vm246_vm1, %v6015_v40  ;;  %v6302_v40 = vld [vmem:[%s5708_s25 + $0xba] sm:$0xff] }
  0xb4   : > { %4970 = vmatprep.mubr.msk.f32.mxu1 %vm246_vm1, %v6205_v20  ;;  %5221 = vmatprep.mubr.msk.f32.mxu0 %vm246_vm1, %v6019_v42  ;;  %v6306_v42 = vld [vmem:[%s5708_s25 + $0xc2] sm:$0xff] }
  0xb7   : > { %4971 = vmatmul.mubr.msk.f32.gmra.mrb[10].mxu1 %vm246_vm1, %v6216_v21  ;;  %5222 = vmatmul.mubr.msk.f32.gmra.mrb[28].mxu0 %vm246_vm1, %v6029_v44  ;;  %v6316_v44 = vld [vmem:[%s5708_s25 + $0xca] sm:$0xff] }
  0xb8   : > { %4973 = vmatprep.mubr.msk.f32.mxu1 %vm246_vm1, %v6219_v22  ;;  %5224 = vmatprep.mubr.msk.f32.mxu0 %vm246_vm1, %v6033_v46  ;;  %v6320_v46 = vld [vmem:[%s5708_s25 + $0xd2] sm:$0xff] }
  0xbb   : > { %4974 = vmatmul.mubr.msk.f32.gmra.mrb[12].mxu1 %vm246_vm1, %v6230_v23  ;;  %5225 = vmatmul.mubr.msk.f32.gmra.mrb[30].mxu0 %vm246_vm1, %v6043_v51  ;;  %v6330_v51 = vld [vmem:[%s5708_s25 + $0xda] sm:$0xff] }
  0xbc   : > { %4976 = vmatprep.mubr.msk.f32.mxu1 %vm246_vm1, %v6233_v24  ;;  %5227 = vmatprep.mubr.msk.f32.mxu0 %vm246_vm1, %v6047_v55  ;;  %v6334_v55 = vld [vmem:[%s5708_s25 + $0xe2] sm:$0xff] }
  0xbf   : > { %4977 = vmatmul.mubr.msk.f32.gmra.mrb[14].mxu1 %vm246_vm1, %v6244_v25  ;;  %5228 = vmatmul.mubr.msk.f32.gmra.mrb[32].mxu0 %vm246_vm1, %v2713_v26  ;;  %v3545_v26 = vld [vmem:[%s5708_s25 + $0x4e] sm:$0xff] }
  0xc0   : > { %4979 = vmatprep.mubr.msk.f32.mxu1 %vm246_vm1, %v6248_v27  ;;  %5230 = vmatprep.mubr.msk.f32.mxu0 %vm246_vm1, %v2714_v11  ;;  %v3547_v11 = vld [vmem:[%s5708_s25 + $0x5e] sm:$0xff] }
  0xc3   : > { %4980 = vmatmul.mubr.msk.f32.gmra.mrb[16].mxu1 %vm246_vm1, %v6258_v28  ;;  %5231 = vmatmul.mubr.msk.f32.gmra.mrb[34].mxu0 %vm246_vm1, %v2715_v29  ;;  %v3549_v29 = vld [vmem:[%s5708_s25 + $0x6e] sm:$0xff] }
  0xc4   : > { %4982 = vmatprep.mubr.msk.f32.mxu1 %vm246_vm1, %v6262_v30  ;;  %5235 = vmatprep.mubr.msk.f32.mxu0 %vm246_vm1, %v3110_v31  ;;  %v3551_v31 = vld [vmem:[%s5708_s25 + $0x7e] sm:$0xff] }
  0xc7   : > { %4983 = vmatmul.mubr.msk.f32.gmra.mrb[18].mxu1 %vm246_vm1, %v6272_v32  ;;  %5236 = vmatmul.mubr.msk.f32.vlgmr.msra.gmra.mrb[0].mxu0 %vm246_vm1, %v3111_v33  ;;  %v3553_v33 = vld [vmem:[%s5708_s25 + $0x8e] sm:$0xff] }
  0xc8   : > { %5290 = vmatpush3.msk.msra.mxu0 %vm355_vm0, %v6068_v4  ;;  %4985 = vmatprep.mubr.msk.f32.mxu1 %vm246_vm1, %v6276_v34  ;;  %v6358_v4 = vld [vmem:[%s5708_s25 + $0xfa] sm:$0xff] }
  0xc9   : > { %5238 = vmatprep.mubr.msk.f32.mxu0 %vm246_vm1, %v3112_v35  ;;  %v1423_v35 = vld [vmem:[%s5708_s25 + $0x11a] sm:$0xff] }
  0xcb   : > { %4986 = vmatmul.mubr.msk.f32.gmra.mrb[20].mxu1 %vm246_vm1, %v6287_v36  ;;  %5239 = vmatmul.mubr.msk.f32.gmra.mrb[2].mxu0 %vm246_vm1, %v3113_v37  ;;  %v1424_v37 = vld [vmem:[%s5708_s25 + $0x122] sm:$0xff] }
  0xcc   : > { %4988 = vmatprep.mubr.msk.f32.mxu1 %vm246_vm1, %v6292_v38  ;;  %5241 = vmatprep.mubr.msk.f32.mxu0 %vm246_vm1, %v3114_v39  ;;  %v1425_v39 = vld [vmem:[%s5708_s25 + $0x12a] sm:$0x3f] }
  0xcf   : > { %4989 = vmatmul.mubr.msk.f32.gmra.mrb[22].mxu1 %vm246_vm1, %v6302_v40  ;;  %5242 = vmatmul.mubr.msk.f32.gmra.mrb[4].mxu0 %vm246_vm1, %v3115_v41  ;;  %v1838_v41 = vld [vmem:[%s5708_s25 + $0xa3] sm:$0xff] }
  0xd0   : > { %4991 = vmatprep.mubr.msk.f32.mxu1 %vm246_vm1, %v6306_v42  ;;  %5244 = vmatprep.mubr.msk.f32.mxu0 %vm246_vm1, %v3116_v43  ;;  %v1839_v43 = vld [vmem:[%s5708_s25 + $0xab] sm:$0xff] }
  0xd3   : > { %4992 = vmatmul.mubr.msk.f32.gmra.mrb[24].mxu1 %vm246_vm1, %v6316_v44  ;;  %5245 = vmatmul.mubr.msk.f32.gmra.mrb[6].mxu0 %vm246_vm1, %v3117_v45  ;;  %v1840_v45 = vld [vmem:[%s5708_s25 + $0xb3] sm:$0xff] }
  0xd4   : > { %4994 = vmatprep.mubr.msk.f32.mxu1 %vm246_vm1, %v6320_v46  ;;  %5247 = vmatprep.mubr.msk.f32.mxu0 %vm246_vm1, %v3118_v49  ;;  %v1841_v49 = vld [vmem:[%s5708_s25 + $0xbb] sm:$0xff] }
  0xd7   : > { %4995 = vmatmul.mubr.msk.f32.gmra.mrb[26].mxu1 %vm246_vm1, %v6330_v51  ;;  %5248 = vmatmul.mubr.msk.f32.gmra.mrb[8].mxu0 %vm246_vm1, %v3119_v53  ;;  %v1842_v53 = vld [vmem:[%s5708_s25 + $0xc3] sm:$0xff] }
  0xd8   : > { %4997 = vmatprep.mubr.msk.f32.mxu1 %vm246_vm1, %v6334_v55  ;;  %5250 = vmatprep.mubr.msk.f32.mxu0 %vm246_vm1, %v3120_v57  ;;  %v1843_v57 = vld [vmem:[%s5708_s25 + $0xcb] sm:$0xff] }
  0xdb   : > { %4998 = vmatmul.mubr.msk.f32.gmra.mrb[28].mxu1 %vm246_vm1, %v6344_v59  ;;  %5251 = vmatmul.mubr.msk.f32.gmra.mrb[10].mxu0 %vm246_vm1, %v3121_v61  ;;  %v1844_v61 = vld [vmem:[%s5708_s25 + $0xd3] sm:$0xff] }
  0xdc   : > { %5000 = vmatprep.mubr.msk.f32.mxu1 %vm246_vm1, %v6348_v63  ;;  %5253 = vmatprep.mubr.msk.f32.mxu0 %vm246_vm1, %v3122_v2  ;;  %v1845_v2 = vld [vmem:[%s5708_s25 + $0xdb] sm:$0xff] }
  0xdf   : > { %5001 = vmatmul.mubr.msk.f32.gmra.mrb[30].mxu1 %vm246_vm1, %v6358_v4  ;;  %5254 = vmatmul.mubr.msk.f32.gmra.mrb[12].mxu0 %vm246_vm1, %v3123_v47  ;;  %v1846_v47 = vld [vmem:[%s5708_s25 + $0xe3] sm:$0xff] }
  0xe0   : > { %5003 = vmatprep.mubr.msk.f32.mxu1 %vm246_vm1, %v6362_v6  ;;  %5256 = vmatprep.mubr.msk.f32.mxu0 %vm246_vm1, %v3124_v48  ;;  %v1847_v48 = vld [vmem:[%s5708_s25 + $0xeb] sm:$0xff] }
  0xe3   : > { %5004 = vmatmul.mubr.msk.f32.gmra.mrb[32].mxu1 %vm246_vm1, %v6372_v50  ;;  %5257 = vmatmul.mubr.msk.f32.gmra.mrb[14].mxu0 %vm246_vm1, %v3125_v52  ;;  %v1848_v52 = vld [vmem:[%s5708_s25 + $0xf3] sm:$0xff] }
  0xe4   : > { %5006 = vmatprep.mubr.msk.f32.mxu1 %vm246_vm1, %v6376_v54  ;;  %5259 = vmatprep.mubr.msk.f32.mxu0 %vm246_vm1, %v3126_v56  ;;  %v1849_v56 = vld [vmem:[%s5708_s25 + $0xfb] sm:$0xff] }
  0xe7   : > { %5007 = vmatmul.mubr.msk.f32.gmra.mrb[34].mxu1 %vm246_vm1, %v995_v58  ;;  %5260 = vmatmul.mubr.msk.f32.gmra.mrb[16].mxu0 %vm246_vm1, %v3127_v60  ;;  %v3569_v58 = vld [vmem:[%s5708_s25 + $0x10e] sm:$0xff]  ;;  %v1850_v60 = vld [vmem:[%s5708_s25 + $0x103] sm:$0xff] }
  0xe8   : > { %5011 = vmatprep.mubr.msk.f32.mxu1 %vm246_vm1, %v6146_v12  ;;  %5262 = vmatprep.mubr.msk.f32.mxu0 %vm246_vm1, %v3128_v62  ;;  %v3137_v12 = vld [vmem:[%s5708_s25 + $0xfd] sm:$0xff] }
  0xe9   : > { %v3570_v62 = vld [vmem:[%s5708_s25 + $0x116] sm:$0xff] }
  0xeb   : > { %5012 = vmatmul.mubr.msk.f32.vlgmr.msra.gmra.mrb[0].mxu1 %vm246_vm1, %v6156_v13  ;;  %5263 = vmatmul.mubr.msk.f32.gmra.mrb[18].mxu0 %vm246_vm1, %v3129_v0  ;;  %v3138_v13 = vld [vmem:[%s5708_s25 + $0x105] sm:$0xff] }
  0xec   : > { %5346 = vmatpush3.msk.msra.mxu1 %vm355_vm0, %v5686_v1  ;;  %5014 = vmatprep.mubr.msk.f32.mxu1 %vm246_vm1, %v6161_v14  ;;  %v3133_v1 = vld [vmem:[%s5708_s25 + $0xdd] sm:$0xff]  ;;  %v3139_v14 = vld [vmem:[%s5708_s25 + $0x10d] sm:$0xff] }
  0xed   : > { %5265 = vmatprep.mubr.msk.f32.mxu0 %vm246_vm1, %v3130_v3  ;;  %v1851_v0 = vld [vmem:[%s5708_s25 + $0x10b] sm:$0xff]  ;;  %v3571_v3 = vld [vmem:[%s5708_s25 + $0x11e] sm:$0xff] }
  0xef   : > { %5015 = vmatmul.mubr.msk.f32.gmra.mrb[2].mxu1 %vm246_vm1, %v6174_v15  ;;  %5266 = vmatmul.mubr.msk.f32.gmra.mrb[20].mxu0 %vm246_vm1, %v3131_v5  ;;  %v3140_v15 = vld [vmem:[%s5708_s25 + $0x115] sm:$0xff] }
  0xf0   : > { %5017 = vmatprep.mubr.msk.f32.mxu1 %vm246_vm1, %v6177_v16  ;;  %5268 = vmatprep.mubr.msk.f32.mxu0 %vm246_vm1, %v3132_v7  ;;  %v3141_v16 = vld [vmem:[%s5708_s25 + $0x11d] sm:$0xff]  ;;  %v1852_v5 = vld [vmem:[%s5708_s25 + $0x113] sm:$0xff]  ;;  %v3572_v7 = vld [vmem:[%s5708_s25 + $0x126] sm:$0xff] }
  0xf3   : > { %5018 = vmatmul.mubr.msk.f32.gmra.mrb[4].mxu1 %vm246_vm1, %v6188_v17  ;;  %5269 = vmatmul.mubr.msk.f32.gmra.mrb[22].mxu0 %vm246_vm1, %v3133_v1  ;;  %v3142_v17 = vld [vmem:[%s5708_s25 + $0x125] sm:$0xff]  ;;  %v1853_v1 = vld [vmem:[%s5708_s25 + $0x11b] sm:$0xff] }
  0xf4   : > { %5020 = vmatprep.mubr.msk.f32.mxu1 %vm246_vm1, %v6191_v18  ;;  %5271 = vmatprep.mubr.msk.f32.mxu0 %vm246_vm1, %v3134_v8  ;;  %v3143_v18 = vld [vmem:[%s5708_s25 + $0x12d] sm:$0xff] }
  0xf5   : > { %v3573_v8 = vld [vmem:[%s5708_s25 + $0x12e] sm:$0xff] }
  0xf7   : > { %5021 = vmatmul.mubr.msk.f32.gmra.mrb[6].mxu1 %vm246_vm1, %v6202_v19  ;;  %5272 = vmatmul.mubr.msk.f32.gmra.mrb[24].mxu0 %vm246_vm1, %v3135_v9  ;;  %v3144_v19 = vld [vmem:[%s5708_s25 + $0x135] sm:$0xff]  ;;  %v1854_v9 = vld [vmem:[%s5708_s25 + $0x123] sm:$0xff] }
  0xf8   : > { %5023 = vmatprep.mubr.msk.f32.mxu1 %vm246_vm1, %v6205_v20  ;;  %5274 = vmatprep.mubr.msk.f32.mxu0 %vm246_vm1, %v3136_v10  ;;  %v3145_v20 = vld [vmem:[%s5708_s25 + $0x13d] sm:$0x3f] }
  0xf9   : > { %v3574_v10 = vld [vmem:[%s5708_s25 + $0x136] sm:$0xff] }
  0xfb   : > { %5024 = vmatmul.mubr.msk.f32.gmra.mrb[8].mxu1 %vm246_vm1, %v6216_v21  ;;  %5275 = vmatmul.mubr.msk.f32.gmra.mrb[26].mxu0 %vm246_vm1, %v3137_v12  ;;  %v3540_v21 = vld [vmem:[%s5708_s25 + $0x26] sm:$0xff] }
  0xfc   : > { %5026 = vmatprep.mubr.msk.f32.mxu1 %vm246_vm1, %v6219_v22  ;;  %5277 = vmatprep.mubr.msk.f32.mxu0 %vm246_vm1, %v3138_v13  ;;  %v3541_v22 = vld [vmem:[%s5708_s25 + $0x2e] sm:$0xff]  ;;  %v3575_v13 = vld [vmem:[%s5708_s25 + $0x13e] sm:$0x3f] }
  0xfd   : > { %v1855_v12 = vld [vmem:[%s5708_s25 + $0x12b] sm:$0x3f] }
  0xff   : > { %5027 = vmatmul.mubr.msk.f32.gmra.mrb[10].mxu1 %vm246_vm1, %v6230_v23  ;;  %5278 = vmatmul.mubr.msk.f32.gmra.mrb[28].mxu0 %vm246_vm1, %v3139_v14  ;;  %v3542_v23 = vld [vmem:[%s5708_s25 + $0x36] sm:$0xff] }
 0x100   : > { %5029 = vmatprep.mubr.msk.f32.mxu1 %vm246_vm1, %v6233_v24  ;;  %5280 = vmatprep.mubr.msk.f32.mxu0 %vm246_vm1, %v3140_v15  ;;  %v3543_v24 = vld [vmem:[%s5708_s25 + $0x3e] sm:$0xff] }
 0x103   : > { %5030 = vmatmul.mubr.msk.f32.gmra.mrb[12].mxu1 %vm246_vm1, %v6244_v25  ;;  %5281 = vmatmul.mubr.msk.f32.gmra.mrb[30].mxu0 %vm246_vm1, %v3141_v16  ;;  %v3544_v25 = vld [vmem:[%s5708_s25 + $0x46] sm:$0xff] }
 0x104   : > { %5032 = vmatprep.mubr.msk.f32.mxu1 %vm246_vm1, %v6248_v27  ;;  %5283 = vmatprep.mubr.msk.f32.mxu0 %vm246_vm1, %v3142_v17  ;;  %v3546_v27 = vld [vmem:[%s5708_s25 + $0x56] sm:$0xff] }
 0x107   : > { %5033 = vmatmul.mubr.msk.f32.gmra.mrb[14].mxu1 %vm246_vm1, %v6258_v28  ;;  %5284 = vmatmul.mubr.msk.f32.gmra.mrb[32].mxu0 %vm246_vm1, %v3143_v18  ;;  %v3548_v28 = vld [vmem:[%s5708_s25 + $0x66] sm:$0xff] }
 0x108   : > { %5035 = vmatprep.mubr.msk.f32.mxu1 %vm246_vm1, %v6262_v30  ;;  %5286 = vmatprep.mubr.msk.f32.mxu0 %vm246_vm1, %v3144_v19  ;;  %v3550_v30 = vld [vmem:[%s5708_s25 + $0x76] sm:$0xff] }
 0x10b   : > { %5036 = vmatmul.mubr.msk.f32.gmra.mrb[16].mxu1 %vm246_vm1, %v6272_v32  ;;  %5287 = vmatmul.mubr.msk.f32.gmra.mrb[34].mxu0 %vm246_vm1, %v3145_v20  ;;  %v3552_v32 = vld [vmem:[%s5708_s25 + $0x86] sm:$0xff] }
 0x10c   : > { %5038 = vmatprep.mubr.msk.f32.mxu1 %vm246_vm1, %v6276_v34  ;;  %5291 = vmatprep.mubr.msk.f32.mxu0 %vm246_vm1, %v3540_v21  ;;  %v3554_v34 = vld [vmem:[%s5708_s25 + $0x96] sm:$0xff] }
 0x10f   : > { %5039 = vmatmul.mubr.msk.f32.gmra.mrb[18].mxu1 %vm246_vm1, %v6287_v36  ;;  %5292 = vmatmul.mubr.msk.f32.vlgmr.msra.gmra.mrb[0].mxu0 %vm246_vm1, %v3541_v22  ;;  %v3555_v36 = vld [vmem:[%s5708_s25 + $0x9e] sm:$0xff] }
 0x110   : > { %5041 = vmatprep.mubr.msk.f32.mxu1 %vm246_vm1, %v6292_v38  ;;  %5294 = vmatprep.mubr.msk.f32.mxu0 %vm246_vm1, %v3542_v23  ;;  %v3556_v38 = vld [vmem:[%s5708_s25 + $0xa6] sm:$0xff] }
 0x113   : > { %5042 = vmatmul.mubr.msk.f32.gmra.mrb[20].mxu1 %vm246_vm1, %v6302_v40  ;;  %5295 = vmatmul.mubr.msk.f32.gmra.mrb[2].mxu0 %vm246_vm1, %v3543_v24  ;;  %v3557_v40 = vld [vmem:[%s5708_s25 + $0xae] sm:$0xff] }
 0x114   : > { %5044 = vmatprep.mubr.msk.f32.mxu1 %vm246_vm1, %v6306_v42  ;;  %5297 = vmatprep.mubr.msk.f32.mxu0 %vm246_vm1, %v3544_v25  ;;  %v3558_v42 = vld [vmem:[%s5708_s25 + $0xb6] sm:$0xff] }
 0x117   : > { %5045 = vmatmul.mubr.msk.f32.gmra.mrb[22].mxu1 %vm246_vm1, %v6316_v44  ;;  %5298 = vmatmul.mubr.msk.f32.gmra.mrb[4].mxu0 %vm246_vm1, %v3545_v26  ;;  %v3559_v44 = vld [vmem:[%s5708_s25 + $0xbe] sm:$0xff] }
 0x118   : > { %5047 = vmatprep.mubr.msk.f32.mxu1 %vm246_vm1, %v6320_v46  ;;  %5300 = vmatprep.mubr.msk.f32.mxu0 %vm246_vm1, %v3546_v27  ;;  %v3560_v46 = vld [vmem:[%s5708_s25 + $0xc6] sm:$0xff] }
 0x11b   : > { %5048 = vmatmul.mubr.msk.f32.gmra.mrb[24].mxu1 %vm246_vm1, %v6330_v51  ;;  %5301 = vmatmul.mubr.msk.f32.gmra.mrb[6].mxu0 %vm246_vm1, %v3547_v11  ;;  %v3561_v51 = vld [vmem:[%s5708_s25 + $0xce] sm:$0xff] }
 0x11c   : > { %5050 = vmatprep.mubr.msk.f32.mxu1 %vm246_vm1, %v6334_v55  ;;  %5303 = vmatprep.mubr.msk.f32.mxu0 %vm246_vm1, %v3548_v28  ;;  %v3562_v55 = vld [vmem:[%s5708_s25 + $0xd6] sm:$0xff] }
 0x11f   : > { %5051 = vmatmul.mubr.msk.f32.gmra.mrb[26].mxu1 %vm246_vm1, %v6344_v59  ;;  %5304 = vmatmul.mubr.msk.f32.gmra.mrb[8].mxu0 %vm246_vm1, %v3549_v29  ;;  %v3563_v59 = vld [vmem:[%s5708_s25 + $0xde] sm:$0xff] }
 0x120   : > { %5053 = vmatprep.mubr.msk.f32.mxu1 %vm246_vm1, %v6348_v63  ;;  %5306 = vmatprep.mubr.msk.f32.mxu0 %vm246_vm1, %v3550_v30  ;;  %v3564_v63 = vld [vmem:[%s5708_s25 + $0xe6] sm:$0xff] }
 0x123   : > { %5054 = vmatmul.mubr.msk.f32.gmra.mrb[28].mxu1 %vm246_vm1, %v6358_v4  ;;  %5307 = vmatmul.mubr.msk.f32.gmra.mrb[10].mxu0 %vm246_vm1, %v3551_v31  ;;  %v3565_v4 = vld [vmem:[%s5708_s25 + $0xee] sm:$0xff] }
 0x124   : > { %5056 = vmatprep.mubr.msk.f32.mxu1 %vm246_vm1, %v6362_v6  ;;  %5309 = vmatprep.mubr.msk.f32.mxu0 %vm246_vm1, %v3552_v32  ;;  %v3566_v6 = vld [vmem:[%s5708_s25 + $0xf6] sm:$0xff]  ;;  %v6626_v32 = vld [vmem:[%s6771_s2] ss:$0 sm:$0xff] }
 0x127   : > { %5057 = vmatmul.mubr.msk.f32.gmra.mrb[30].mxu1 %vm246_vm1, %v6372_v50  ;;  %5310 = vmatmul.mubr.msk.f32.gmra.mrb[12].mxu0 %vm246_vm1, %v3553_v33  ;;  %v3567_v50 = vld [vmem:[%s5708_s25 + $0xfe] sm:$0xff] }
 0x128   : > { %5059 = vmatprep.mubr.msk.f32.mxu1 %vm246_vm1, %v6376_v54  ;;  %5312 = vmatprep.mubr.msk.f32.mxu0 %vm246_vm1, %v3554_v34  ;;  %v3568_v54 = vld [vmem:[%s5708_s25 + $0x106] sm:$0xff] }
 0x12b   : > { %5060 = vmatmul.mubr.msk.f32.gmra.mrb[32].mxu1 %vm246_vm1, %v1423_v35  ;;  %5313 = vmatmul.mubr.msk.f32.gmra.mrb[14].mxu0 %vm246_vm1, %v3555_v36 }
 0x12c   : > { %5062 = vmatprep.mubr.msk.f32.mxu1 %vm246_vm1, %v1424_v37  ;;  %5315 = vmatprep.mubr.msk.f32.mxu0 %vm246_vm1, %v3556_v38 }
 0x12f   : > { %5063 = vmatmul.mubr.msk.f32.gmra.mrb[34].mxu1 %vm246_vm1, %v1425_v39  ;;  %5316 = vmatmul.mubr.msk.f32.gmra.mrb[16].mxu0 %vm246_vm1, %v3557_v40 }
 0x130   : > { %5094 = vmatprep.mubr.msk.f32.mxu1 %vm246_vm1, %v1838_v41  ;;  %5318 = vmatprep.mubr.msk.f32.mxu0 %vm246_vm1, %v3558_v42 }
 0x133   : > { %5095 = vmatmul.mubr.msk.f32.vlgmr.msra.gmra.mrb[18].mxu1 %vm246_vm1, %v1839_v43  ;;  %5319 = vmatmul.mubr.msk.f32.gmra.mrb[18].mxu0 %vm246_vm1, %v3559_v44 }
 0x134   : > { %5097 = vmatprep.mubr.msk.f32.mxu1 %vm246_vm1, %v1840_v45  ;;  %5321 = vmatprep.mubr.msk.f32.mxu0 %vm246_vm1, %v3560_v46 }
 0x137   : > { %5098 = vmatmul.mubr.msk.f32.gmra.mrb[20].mxu1 %vm246_vm1, %v1841_v49  ;;  %5322 = vmatmul.mubr.msk.f32.gmra.mrb[20].mxu0 %vm246_vm1, %v3561_v51 }
 0x138   : > { %5100 = vmatprep.mubr.msk.f32.mxu1 %vm246_vm1, %v1842_v53  ;;  %5324 = vmatprep.mubr.msk.f32.mxu0 %vm246_vm1, %v3562_v55 }
 0x13b   : > { %5101 = vmatmul.mubr.msk.f32.gmra.mrb[22].mxu1 %vm246_vm1, %v1843_v57  ;;  %5325 = vmatmul.mubr.msk.f32.gmra.mrb[22].mxu0 %vm246_vm1, %v3563_v59 }
 0x13c   : > { %5103 = vmatprep.mubr.msk.f32.mxu1 %vm246_vm1, %v1844_v61  ;;  %5327 = vmatprep.mubr.msk.f32.mxu0 %vm246_vm1, %v3564_v63 }
 0x13f   : > { %5104 = vmatmul.mubr.msk.f32.gmra.mrb[24].mxu1 %vm246_vm1, %v1845_v2  ;;  %5328 = vmatmul.mubr.msk.f32.gmra.mrb[24].mxu0 %vm246_vm1, %v3565_v4 }
 0x140   : > { %5106 = vmatprep.mubr.msk.f32.mxu1 %vm246_vm1, %v1846_v47  ;;  %5330 = vmatprep.mubr.msk.f32.mxu0 %vm246_vm1, %v3566_v6 }
 0x143   : > { %5107 = vmatmul.mubr.msk.f32.gmra.mrb[26].mxu1 %vm246_vm1, %v1847_v48  ;;  %5331 = vmatmul.mubr.msk.f32.gmra.mrb[26].mxu0 %vm246_vm1, %v3567_v50 }
 0x144   : > { %5109 = vmatprep.mubr.msk.f32.mxu1 %vm246_vm1, %v1848_v52  ;;  %5333 = vmatprep.mubr.msk.f32.mxu0 %vm246_vm1, %v3568_v54 }
 0x147   : > { %5110 = vmatmul.mubr.msk.f32.gmra.mrb[28].mxu1 %vm246_vm1, %v1849_v56  ;;  %5334 = vmatmul.mubr.msk.f32.gmra.mrb[28].mxu0 %vm246_vm1, %v3569_v58 }
 0x148   : > { %5112 = vmatprep.mubr.msk.f32.mxu1 %vm246_vm1, %v1850_v60  ;;  %5336 = vmatprep.mubr.msk.f32.mxu0 %vm246_vm1, %v3570_v62 }
 0x14b   : > { %5113 = vmatmul.mubr.msk.f32.gmra.mrb[30].mxu1 %vm246_vm1, %v1851_v0  ;;  %5337 = vmatmul.mubr.msk.f32.gmra.mrb[30].mxu0 %vm246_vm1, %v3571_v3 }
 0x14c   : > { %5115 = vmatprep.mubr.msk.f32.mxu1 %vm246_vm1, %v1852_v5  ;;  %5339 = vmatprep.mubr.msk.f32.mxu0 %vm246_vm1, %v3572_v7 }
 0x14f   : > { %5116 = vmatmul.mubr.msk.f32.gmra.mrb[32].mxu1 %vm246_vm1, %v1853_v1  ;;  %5340 = vmatmul.mubr.msk.f32.gmra.mrb[32].mxu0 %vm246_vm1, %v3573_v8 }
 0x150   : > { %5118 = vmatprep.mubr.msk.f32.mxu1 %vm246_vm1, %v1854_v9  ;;  %5342 = vmatprep.mubr.msk.f32.mxu0 %vm246_vm1, %v3574_v10 }
 0x153   : > { %5119 = vmatmul.mubr.msk.f32.gmra.mrb[34].mxu1 %vm246_vm1, %v1855_v12  ;;  %5343 = vmatmul.mubr.msk.f32.gmra.mrb[34].mxu0 %vm246_vm1, %v3575_v13 }
 0x1be   : > { %v5013_v14 = vpop.f32.mrb[0].mxu1 }
 0x1bf   : > { %v1605_v15 = vpop.f32.mrb[1].mxu1 }
 0x1c2   : > { %v5016_v16 = vpop.f32.mrb[2].mxu1 }
 0x1c3   : > { %v1615_v17 = vpop.f32.mrb[3].mxu1 }
 0x1c6   : > { %v5019_v18 = vpop.f32.mrb[4].mxu1 }
 0x1c7   : > { %v1625_v19 = vpop.f32.mrb[5].mxu1 }
 0x1ca   : > { %v5022_v20 = vpop.f32.mrb[6].mxu1 }
 0x1cb   : > { %v1635_v21 = vpop.f32.mrb[7].mxu1 }
 0x1ce   : > { %v5025_v22 = vpop.f32.mrb[8].mxu1 }
 0x1cf   : > { %v1645_v23 = vpop.f32.mrb[9].mxu1 }
 0x1d2   : > { %v6607_v24 = vpop.f32.mrb[10].mxu1 }
 0x1d3   : > { %v6609_v25 = vpop.f32.mrb[11].mxu1 }
 0x1d6   : > { %v6611_v26 = vpop.f32.mrb[12].mxu1 }
 0x1d7   : > { %v6613_v27 = vpop.f32.mrb[13].mxu1 }
 0x1da   : > { %v6615_v11 = vpop.f32.mrb[14].mxu1 }
 0x1db   : > { %v6617_v28 = vpop.f32.mrb[15].mxu1 }
 0x1de   : > { %v6619_v29 = vpop.f32.mrb[16].mxu1 }
 0x1df   : > { %v6621_v30 = vpop.f32.mrb[17].mxu1 }
 0x1e2   : > { %v5293_v31 = vpop.f32.mrb[0].mxu0 }
 0x1e3   : > { %v5347_v33 = vadd.f32 %v5293_v31, %v5013_v14  ;;  %v3755_v34 = vpop.f32.mrb[1].mxu0 }
 0x1e4   : > { %v5348_v35 = vadd.f32 %v3755_v34, %v1605_v15 }
 0x1e5   : > { %v3978_v36 = vadd.f32 %v5347_v33, %v6626_v32 }
 0x1e6   : > { %v3977_v37 = vadd.f32 %v5348_v35, %v6626_v32  ;;  %v5296_v38 = vpop.f32.mrb[2].mxu0 }
 0x1e7   : > { %v4014_v39 = vmax.f32 %v3978_v36, 0.0  ;;  %v5349_v40 = vadd.f32 %v5296_v38, %v5016_v16  ;;  %v3765_v41 = vpop.f32.mrb[3].mxu0 }
 0x1e8   : > { %v4013_v42 = vmax.f32 %v3977_v37, 0.0  ;;  %v5350_v43 = vadd.f32 %v3765_v41, %v1615_v17 }
 0x1e9   : > { %4051 = vst.msk [vmem:[%s6633_s16 + $0x8] sm:$0xff] %vm4049_vm2, %v4014_v39  ;;  %v3980_v44 = vadd.f32 %v5349_v40, %v6626_v32 }
 0x1ea   : > { %4050 = vst.msk [vmem:[%s6633_s16] sm:$0xff] %vm4049_vm2, %v4013_v42  ;;  %v3979_v45 = vadd.f32 %v5350_v43, %v6626_v32  ;;  %v5299_v46 = vpop.f32.mrb[4].mxu0 }
 0x1eb   : > { %v4016_v49 = vmax.f32 %v3980_v44, 0.0  ;;  %v5351_v51 = vadd.f32 %v5299_v46, %v5019_v18  ;;  %v3775_v53 = vpop.f32.mrb[5].mxu0 }
 0x1ec   : > { %v4015_v55 = vmax.f32 %v3979_v45, 0.0  ;;  %v5352_v57 = vadd.f32 %v3775_v53, %v1625_v19 }
 0x1ed   : > { %4054 = vst.msk [vmem:[%s6633_s16 + $0x16] sm:$0xff] %vm4049_vm2, %v4016_v49  ;;  %v3982_v59 = vadd.f32 %v5351_v51, %v6626_v32 }
 0x1ee   : > { %4053 = vst.msk [vmem:[%s6633_s16 + $0xe] sm:$0xfc] %vm4052_vm3, %v4015_v55  ;;  %v3981_v61 = vadd.f32 %v5352_v57, %v6626_v32  ;;  %v5302_v63 = vpop.f32.mrb[6].mxu0 }
 0x1ef   : > { %v4018_v2 = vmax.f32 %v3982_v59, 0.0  ;;  %v5353_v4 = vadd.f32 %v5302_v63, %v5022_v20  ;;  %v3785_v47 = vpop.f32.mrb[7].mxu0 }
 0x1f0   : > { %v4017_v6 = vmax.f32 %v3981_v61, 0.0  ;;  %v5354_v48 = vadd.f32 %v3785_v47, %v1635_v21 }
 0x1f1   : > { %4059 = vst.msk [vmem:[%s6633_s16 + $0x24] sm:$0xff] %vm4049_vm2, %v4018_v2  ;;  %v3984_v50 = vadd.f32 %v5353_v4, %v6626_v32 }
 0x1f2   : > { %4056 = vst.msk [vmem:[%s6633_s16 + $0x1e] sm:$0x3] %vm4055_vm4, %v4017_v6  ;;  %v3983_v52 = vadd.f32 %v5354_v48, %v6626_v32  ;;  %v5305_v54 = vpop.f32.mrb[8].mxu0 }
 0x1f3   : > { %4058 = vst.msk [vmem:[%s6633_s16 + $0x1c] sm:$0xf0] %vm4057_vm5, %v4017_v6  ;;  %v4020_v56 = vmax.f32 %v3984_v50, 0.0  ;;  %v5355_v58 = vadd.f32 %v5305_v54, %v5025_v22  ;;  %v3795_v60 = vpop.f32.mrb[9].mxu0 }
 0x1f4   : > { %v4019_v62 = vmax.f32 %v3983_v52, 0.0  ;;  %v5356_v0 = vadd.f32 %v3795_v60, %v1645_v23 }
 0x1f5   : > { %4064 = vst.msk [vmem:[%s6633_s16 + $0x32] sm:$0xff] %vm4049_vm2, %v4020_v56  ;;  %v3986_v3 = vadd.f32 %v5355_v58, %v6626_v32 }
 0x1f6   : > { %4061 = vst.msk [vmem:[%s6633_s16 + $0x2c] sm:$0xf] %vm4060_vm6, %v4019_v62  ;;  %v3985_v5 = vadd.f32 %v5356_v0, %v6626_v32  ;;  %v5308_v7 = vpop.f32.mrb[10].mxu0 }
 0x1f7   : > { %4063 = vst.msk [vmem:[%s6633_s16 + $0x2a] sm:$0xc0] %vm4062_vm7, %v4019_v62  ;;  %v4022_v1 = vmax.f32 %v3986_v3, 0.0  ;;  %v5357_v8 = vadd.f32 %v5308_v7, %v6607_v24  ;;  %v3805_v9 = vpop.f32.mrb[11].mxu0 }
 0x1f8   : > { %v4021_v10 = vmax.f32 %v3985_v5, 0.0  ;;  %v5358_v12 = vadd.f32 %v3805_v9, %v6609_v25 }
 0x1f9   : > { %4067 = vst.msk [vmem:[%s6633_s16 + $0x40] sm:$0xff] %vm4049_vm2, %v4022_v1  ;;  %v3988_v13 = vadd.f32 %v5357_v8, %v6626_v32 }
 0x1fa   : > { %4066 = vst.msk [vmem:[%s6633_s16 + $0x3a] sm:$0x3f] %vm4065_vm8, %v4021_v10  ;;  %v3987_v14 = vadd.f32 %v5358_v12, %v6626_v32  ;;  %v5311_v15 = vpop.f32.mrb[12].mxu0 }
 0x1fb   : > { %v4024_v16 = vmax.f32 %v3988_v13, 0.0  ;;  %v5359_v17 = vadd.f32 %v5311_v15, %v6611_v26  ;;  %v3815_v18 = vpop.f32.mrb[13].mxu0 }
 0x1fc   : > { %v4023_v19 = vmax.f32 %v3987_v14, 0.0  ;;  %v5360_v20 = vadd.f32 %v3815_v18, %v6613_v27 }
 0x1fd   : > { %4069 = vst.msk [vmem:[%s6633_s16 + $0x4e] sm:$0xfc] %vm4052_vm3, %v4024_v16  ;;  %v3990_v21 = vadd.f32 %v5359_v17, %v6626_v32 }
 0x1fe   : > { %4068 = vst.msk [vmem:[%s6633_s16 + $0x48] sm:$0xff] %vm4049_vm2, %v4023_v19  ;;  %v3989_v22 = vadd.f32 %v5360_v20, %v6626_v32  ;;  %v5314_v23 = vpop.f32.mrb[14].mxu0 }
 0x1ff   : > { %v4026_v24 = vmax.f32 %v3990_v21, 0.0  ;;  %v5361_v25 = vadd.f32 %v5314_v23, %v6615_v11  ;;  %v3825_v26 = vpop.f32.mrb[15].mxu0 }
 0x200   : > { %v4025_v31 = vmax.f32 %v3989_v22, 0.0  ;;  %v5362_v33 = vadd.f32 %v3825_v26, %v6617_v28 }
 0x201   : > { %4071 = vst.msk [vmem:[%s6633_s16 + $0x5e] sm:$0x3] %vm4055_vm4, %v4026_v24  ;;  %v3992_v27 = vadd.f32 %v5361_v25, %v6626_v32 }
 0x202   : > { %4072 = vst.msk [vmem:[%s6633_s16 + $0x5c] sm:$0xf0] %vm4057_vm5, %v4026_v24  ;;  %v3991_v34 = vadd.f32 %v5362_v33, %v6626_v32  ;;  %v5317_v35 = vpop.f32.mrb[16].mxu0 }
 0x203   : > { %4070 = vst.msk [vmem:[%s6633_s16 + $0x56] sm:$0xff] %vm4049_vm2, %v4025_v31  ;;  %v4028_v36 = vmax.f32 %v3992_v27, 0.0  ;;  %v5363_v11 = vadd.f32 %v5317_v35, %v6619_v29  ;;  %v3835_v37 = vpop.f32.mrb[17].mxu0 }
 0x204   : > { %v4027_v38 = vmax.f32 %v3991_v34, 0.0  ;;  %v5364_v39 = vadd.f32 %v3835_v37, %v6621_v30 }
 0x205   : > { %4074 = vst.msk [vmem:[%s6633_s16 + $0x6c] sm:$0xf] %vm4060_vm6, %v4028_v36  ;;  %v3994_v28 = vadd.f32 %v5363_v11, %v6626_v32 }
 0x206   : > { %4075 = vst.msk [vmem:[%s6633_s16 + $0x6a] sm:$0xc0] %vm4062_vm7, %v4028_v36  ;;  %v3993_v40 = vadd.f32 %v5364_v39, %v6626_v32  ;;  %v5096_v41 = vpop.f32.mrb[18].mxu1  ;;  %v5320_v42 = vpop.f32.mrb[18].mxu0 }
 0x207   : > { %4073 = vst.msk [vmem:[%s6633_s16 + $0x64] sm:$0xff] %vm4049_vm2, %v4027_v38  ;;  %v4030_v43 = vmax.f32 %v3994_v28, 0.0  ;;  %v5365_v29 = vadd.f32 %v5320_v42, %v5096_v41  ;;  %v2125_v44 = vpop.f32.mrb[19].mxu1  ;;  %v3845_v45 = vpop.f32.mrb[19].mxu0 }
 0x208   : > { %v4029_v46 = vmax.f32 %v3993_v40, 0.0  ;;  %v5366_v30 = vadd.f32 %v3845_v45, %v2125_v44 }
 0x209   : > { %4077 = vst.msk [vmem:[%s6633_s16 + $0x7a] sm:$0x3f] %vm4065_vm8, %v4030_v43  ;;  %v3996_v49 = vadd.f32 %v5365_v29, %v6626_v32 }
 0x20a   : > { %4076 = vst.msk [vmem:[%s6633_s16 + $0x72] sm:$0xff] %vm4049_vm2, %v4029_v46  ;;  %v3995_v51 = vadd.f32 %v5366_v30, %v6626_v32  ;;  %v5099_v53 = vpop.f32.mrb[20].mxu1  ;;  %v5323_v55 = vpop.f32.mrb[20].mxu0 }
 0x20b   : > { %v4032_v57 = vmax.f32 %v3996_v49, 0.0  ;;  %v5367_v59 = vadd.f32 %v5323_v55, %v5099_v53  ;;  %v2135_v61 = vpop.f32.mrb[21].mxu1  ;;  %v3855_v63 = vpop.f32.mrb[21].mxu0 }
 0x20c   : > { %v4031_v2 = vmax.f32 %v3995_v51, 0.0  ;;  %v5368_v4 = vadd.f32 %v3855_v63, %v2135_v61 }
 0x20d   : > { %4079 = vst.msk [vmem:[%s6633_s16 + $0x88] sm:$0xff] %vm4049_vm2, %v4032_v57  ;;  %v3998_v47 = vadd.f32 %v5367_v59, %v6626_v32 }
 0x20e   : > { %4078 = vst.msk [vmem:[%s6633_s16 + $0x80] sm:$0xff] %vm4049_vm2, %v4031_v2  ;;  %v3997_v6 = vadd.f32 %v5368_v4, %v6626_v32  ;;  %v5102_v48 = vpop.f32.mrb[22].mxu1  ;;  %v5326_v50 = vpop.f32.mrb[22].mxu0 }
 0x20f   : > { %v4034_v52 = vmax.f32 %v3998_v47, 0.0  ;;  %v5369_v54 = vadd.f32 %v5326_v50, %v5102_v48  ;;  %v2145_v56 = vpop.f32.mrb[23].mxu1  ;;  %v3865_v58 = vpop.f32.mrb[23].mxu0 }
 0x210   : > { %v4033_v60 = vmax.f32 %v3997_v6, 0.0  ;;  %v5370_v62 = vadd.f32 %v3865_v58, %v2145_v56 }
 0x211   : > { %4081 = vst.msk [vmem:[%s6633_s16 + $0x96] sm:$0xff] %vm4049_vm2, %v4034_v52  ;;  %v4000_v0 = vadd.f32 %v5369_v54, %v6626_v32 }
 0x212   : > { %4080 = vst.msk [vmem:[%s6633_s16 + $0x8e] sm:$0xfc] %vm4052_vm3, %v4033_v60  ;;  %v3999_v3 = vadd.f32 %v5370_v62, %v6626_v32  ;;  %v5105_v5 = vpop.f32.mrb[24].mxu1  ;;  %v5329_v7 = vpop.f32.mrb[24].mxu0 }
 0x213   : > { %v4036_v1 = vmax.f32 %v4000_v0, 0.0  ;;  %v5371_v8 = vadd.f32 %v5329_v7, %v5105_v5  ;;  %v2155_v9 = vpop.f32.mrb[25].mxu1  ;;  %v3875_v10 = vpop.f32.mrb[25].mxu0 }
 0x214   : > { %v4035_v12 = vmax.f32 %v3999_v3, 0.0  ;;  %v5372_v13 = vadd.f32 %v3875_v10, %v2155_v9 }
 0x215   : > { %4084 = vst.msk [vmem:[%s6633_s16 + $0xa4] sm:$0xff] %vm4049_vm2, %v4036_v1  ;;  %v4002_v14 = vadd.f32 %v5371_v8, %v6626_v32 }
 0x216   : > { %4082 = vst.msk [vmem:[%s6633_s16 + $0x9e] sm:$0x3] %vm4055_vm4, %v4035_v12  ;;  %v4001_v15 = vadd.f32 %v5372_v13, %v6626_v32  ;;  %v5108_v16 = vpop.f32.mrb[26].mxu1  ;;  %v5332_v17 = vpop.f32.mrb[26].mxu0 }
 0x217   : > { %4083 = vst.msk [vmem:[%s6633_s16 + $0x9c] sm:$0xf0] %vm4057_vm5, %v4035_v12  ;;  %v4038_v18 = vmax.f32 %v4002_v14, 0.0  ;;  %v5373_v19 = vadd.f32 %v5332_v17, %v5108_v16  ;;  %v2165_v20 = vpop.f32.mrb[27].mxu1  ;;  %v3885_v21 = vpop.f32.mrb[27].mxu0 }
 0x218   : > { %v4037_v22 = vmax.f32 %v4001_v15, 0.0  ;;  %v5374_v23 = vadd.f32 %v3885_v21, %v2165_v20 }
 0x219   : > { %4087 = vst.msk [vmem:[%s6633_s16 + $0xb2] sm:$0xff] %vm4049_vm2, %v4038_v18  ;;  %v4004_v24 = vadd.f32 %v5373_v19, %v6626_v32 }
 0x21a   : > { %4085 = vst.msk [vmem:[%s6633_s16 + $0xac] sm:$0xf] %vm4060_vm6, %v4037_v22  ;;  %v4003_v25 = vadd.f32 %v5374_v23, %v6626_v32  ;;  %v5111_v26 = vpop.f32.mrb[28].mxu1  ;;  %v5335_v31 = vpop.f32.mrb[28].mxu0 }
 0x21b   : > { %4086 = vst.msk [vmem:[%s6633_s16 + $0xaa] sm:$0xc0] %vm4062_vm7, %v4037_v22  ;;  %v4040_v33 = vmax.f32 %v4004_v24, 0.0  ;;  %v5375_v27 = vadd.f32 %v5335_v31, %v5111_v26  ;;  %v2175_v34 = vpop.f32.mrb[29].mxu1  ;;  %v3895_v35 = vpop.f32.mrb[29].mxu0 }
 0x21c   : > { %v4039_v36 = vmax.f32 %v4003_v25, 0.0  ;;  %v5376_v11 = vadd.f32 %v3895_v35, %v2175_v34 }
 0x21d   : > { %4089 = vst.msk [vmem:[%s6633_s16 + $0xc0] sm:$0xff] %vm4049_vm2, %v4040_v33  ;;  %v4006_v37 = vadd.f32 %v5375_v27, %v6626_v32 }
 0x21e   : > { %4088 = vst.msk [vmem:[%s6633_s16 + $0xba] sm:$0x3f] %vm4065_vm8, %v4039_v36  ;;  %v4005_v38 = vadd.f32 %v5376_v11, %v6626_v32  ;;  %v5114_v39 = vpop.f32.mrb[30].mxu1  ;;  %v5338_v28 = vpop.f32.mrb[30].mxu0 }
 0x21f   : > { %v4042_v40 = vmax.f32 %v4006_v37, 0.0  ;;  %v5377_v41 = vadd.f32 %v5338_v28, %v5114_v39  ;;  %v2185_v42 = vpop.f32.mrb[31].mxu1  ;;  %v3905_v43 = vpop.f32.mrb[31].mxu0 }
 0x220   : > { %v4041_v29 = vmax.f32 %v4005_v38, 0.0  ;;  %v5378_v44 = vadd.f32 %v3905_v43, %v2185_v42 }
 0x221   : > { %4091 = vst.msk [vmem:[%s6633_s16 + $0xce] sm:$0xfc] %vm4052_vm3, %v4042_v40  ;;  %v4008_v45 = vadd.f32 %v5377_v41, %v6626_v32 }
 0x222   : > { %4090 = vst.msk [vmem:[%s6633_s16 + $0xc8] sm:$0xff] %vm4049_vm2, %v4041_v29  ;;  %v4007_v46 = vadd.f32 %v5378_v44, %v6626_v32  ;;  %v5117_v30 = vpop.f32.mrb[32].mxu1  ;;  %v5341_v49 = vpop.f32.mrb[32].mxu0 }
 0x223   : > { %v4044_v51 = vmax.f32 %v4008_v45, 0.0  ;;  %v5379_v53 = vadd.f32 %v5341_v49, %v5117_v30  ;;  %v2195_v55 = vpop.f32.mrb[33].mxu1  ;;  %v3915_v57 = vpop.f32.mrb[33].mxu0 }
 0x224   : > { %v4043_v59 = vmax.f32 %v4007_v46, 0.0  ;;  %v5380_v61 = vadd.f32 %v3915_v57, %v2195_v55 }
 0x225   : > { %4093 = vst.msk [vmem:[%s6633_s16 + $0xde] sm:$0x3] %vm4055_vm4, %v4044_v51  ;;  %v4010_v63 = vadd.f32 %v5379_v53, %v6626_v32 }
 0x226   : > { %4094 = vst.msk [vmem:[%s6633_s16 + $0xdc] sm:$0xf0] %vm4057_vm5, %v4044_v51  ;;  %v4009_v2 = vadd.f32 %v5380_v61, %v6626_v32  ;;  %v5120_v4 = vpop.f32.mrb[34].mxu1  ;;  %v5344_v47 = vpop.f32.mrb[34].mxu0 }
 0x227   : > { %4092 = vst.msk [vmem:[%s6633_s16 + $0xd6] sm:$0xff] %vm4049_vm2, %v4043_v59  ;;  %v4046_v6 = vmax.f32 %v4010_v63, 0.0  ;;  %v5381_v48 = vadd.f32 %v5344_v47, %v5120_v4  ;;  %v2205_v50 = vpop.f32.mrb[35].mxu1  ;;  %v3925_v52 = vpop.f32.mrb[35].mxu0 }
 0x228   : > { %v4045_v54 = vmax.f32 %v4009_v2, 0.0  ;;  %v5382_v56 = vadd.f32 %v3925_v52, %v2205_v50 }
 0x229   : > { %4096 = vst.msk [vmem:[%s6633_s16 + $0xec] sm:$0xf] %vm4060_vm6, %v4046_v6  ;;  %v4012_v58 = vadd.f32 %v5381_v48, %v6626_v32 }
 0x22a   : > { %4097 = vst.msk [vmem:[%s6633_s16 + $0xea] sm:$0xc0] %vm4062_vm7, %v4046_v6  ;;  %v4011_v60 = vadd.f32 %v5382_v56, %v6626_v32 }
 0x22b   : > { %4095 = vst.msk [vmem:[%s6633_s16 + $0xe4] sm:$0xff] %vm4049_vm2, %v4045_v54  ;;  %v4048_v62 = vmax.f32 %v4012_v58, 0.0 }
 0x22c   : > { %v4047_v0 = vmax.f32 %v4011_v60, 0.0 }
 0x22d   : > { %4099 = vst.msk [vmem:[%s6633_s16 + $0xfa] sm:$0x3f] %vm4065_vm8, %v4048_v62 }
 0x22e   : > { %4098 = vst.msk [vmem:[%s6633_s16 + $0xf2] sm:$0xff] %vm4049_vm2, %v4047_v0 }
 0x22f PF: > { %s13_s12 = sadd.s32 1, %s5650_s12  }
 0x230   : > { %p10_p4 = scmp.ge.s32.totalorder %s13_s12, 4  }
 0x232   :  { %12 = sbr.rel (!%p10_p4) target bundleno = 1 (0x1), region = 70 }

</bundles_post_ra>
